<compile_context>
chip_gen: v7x
topology: tpu7x:2x2x1
jax: 0.10.0
libtpu: 0.0.40
codegen_flags: <defaults>
</compile_context>

<pallas_src>
import functools
import numpy as np
import jax
import jax.numpy as jnp
from jax import lax
from jax.experimental import pallas as pl
from jax.experimental.pallas import tpu as pltpu

EPS = 1e-5
NEG_SLOPE = 0.01   # PyTorch LeakyReLU default


# ------------------------------ fused Pallas kernel --------------------------

def fused_bag_kernel(x_ref, band1, bias1, band2, bias2, band3, bias3,
                     wp_ref, scale_ref, shift_ref, w1_ref, b1_ref, w2_ref, b2_ref,
                     o_ref,
                     pad1, pad2, pad3, pm_ref, pool_ref,
                     *, seq, cfg):
    """Whole forward for one bag (seq images): 3x[conv+BN2d+LeakyReLU+pool],
    flatten, Linear projection, BN1d glue, MIN over the bag, 2-layer MLP head."""
    n = seq
    pads = (pad1, pad2, pad3)
    bands = (band1, band2, band3)
    biases = (bias1, bias2, bias3)

    # Zero the padded-activation scratches (the 1-pixel halo must be zero).
    for p in pads:
        p[...] = jnp.zeros_like(p)

    # Scatter the packed input rows into the layer-1 padded layout:
    # per-image block of (H+2) rows, lane halo of cin on each side.
    h0, cin0, _ = cfg[0]
    hp0 = h0 + 2
    x = x_ref[0]                                        # (seq*h0, h0*cin0)
    for i in range(n):
        pad1[i * hp0 + 1:i * hp0 + 1 + h0, cin0:cin0 + h0 * cin0] = \
            x[i * h0:(i + 1) * h0, :]

    def conv_layer(pad_ref, band_ref, bias_ref, h, cout):
        """3x3 conv (+folded BN2d) + LeakyReLU + 2x2 max-pool for all images."""
        hp = h + 2
        R = n * hp - 2                                  # rows of the banded matmul
        half = (h // 2) * cout                          # lanes per W-pool phase
        acc = jnp.dot(pad_ref[0:R, :].astype(jnp.bfloat16), band_ref[0],
                      preferred_element_type=jnp.float32)
        for dy in (1, 2):
            acc = acc + jnp.dot(pad_ref[dy:dy + R, :].astype(jnp.bfloat16),
                                band_ref[dy], preferred_element_type=jnp.float32)
        act = acc + bias_ref[...]
        act = jnp.where(act > 0, act, NEG_SLOPE * act)            # LeakyReLU
        pm = jnp.maximum(act[:, :half], act[:, half:])            # max-pool over W
        pm_ref[0:R, 0:half] = pm
        ev = pm_ref[pl.ds(0, R // 2, stride=2), 0:half]           # conv rows 2q
        od = pm_ref[pl.ds(1, R // 2, stride=2), 0:half]           # conv rows 2q+1
        return jnp.maximum(ev, od)    # pooled row (i, q) lives at i*(hp//2) + q

    def repack(pooled, dst_ref, h_prev, cout_prev):
        """Write a pooled layer output into the next layer's padded scratch."""
        h2 = h_prev // 2
        src_stride = (h_prev + 2) // 2
        hp_new = h2 + 2
        for i in range(n):
            dst_ref[i * hp_new + 1:i * hp_new + 1 + h2,
                    cout_prev:cout_prev + h2 * cout_prev] = \
                pooled[i * src_stride:i * src_stride + h2, :]

    pooled = None
    for li, (h, _cin, cout) in enumerate(cfg):
        pooled = conv_layer(pads[li], bands[li], biases[li], h, cout)
        if li + 1 < len(cfg):
            repack(pooled, pads[li + 1], h, cout)

    # Flatten the last pooled layer into (n, d_model) features, (h, w, c) order.
    h_last, _, cout_last = cfg[-1]
    w_last = h_last // 2
    src_stride = (h_last + 2) // 2
    rp = n * src_stride - 1
    pool_ref[0:rp, :] = pooled
    feat = jnp.concatenate(
        [pool_ref[pl.ds(q, n, stride=src_stride), :] for q in range(w_last)],
        axis=1)                                         # (n, d_model)

    # Projection + BN1d glue (precomputed per-element affine) + MIN over the bag.
    # Dropout(0.5) is identity under inference-mode forward semantics.
    proj = jnp.dot(feat, wp_ref[...], preferred_element_type=jnp.float32)
    y = proj * scale_ref[0] + shift_ref[0]
    agg = jnp.min(y, axis=0, keepdims=True)             # (1, hidden): this block = one bag

    # Head MLP.
    h1 = jnp.dot(agg, w1_ref[...], preferred_element_type=jnp.float32) + b1_ref[...]
    h1 = jnp.maximum(h1, 0.0)                           # ReLU
    o_ref[0] = jnp.dot(h1, w2_ref[...], preferred_element_type=jnp.float32) + b2_ref[...]


# ------------------------------ wrapper ---------------------------------------

def bag_image_model_forward(x, params, conv_tables, head_tables):
    bsz, seq, cin0, h, w = x.shape
    n = bsz * seq
    hd = params["hidden_dim"]
    nc = params["num_classes"]

    cfg = []
    hcur = params["image_size"]
    for layer in params["conv"]:
        cout, cin = layer["w"].shape[0], layer["w"].shape[1]
        cfg.append((hcur, cin, cout))
        hcur //= 2
    cfg = tuple(cfg)

    # Pack images as 2-D tiles (rows = H, lanes = (w, c)); group rows per bag.
    xp = jnp.transpose(x.reshape(n, cin0, h, w), (0, 2, 3, 1))
    xp = xp.reshape(bsz, seq * h, w * cin0)

    scale_arr, shift_arr = head_tables
    scale3 = scale_arr.reshape(bsz, seq, hd)
    shift3 = shift_arr.reshape(bsz, seq, hd)

    band1, bias1 = conv_tables[0]
    band2, bias2 = conv_tables[1]
    band3, bias3 = conv_tables[2]
    wp = params["wp"]
    w1 = params["w1"]
    b1 = params["b1"].reshape(1, -1)
    w2 = params["w2"]
    b2 = params["b2"].reshape(1, -1)

    def const_spec(a):
        nd = a.ndim
        return pl.BlockSpec(a.shape, lambda b, _nd=nd: (0,) * _nd)

    in_specs = [
        pl.BlockSpec((1, seq * h, w * cin0), lambda b: (b, 0, 0)),   # packed images
        const_spec(band1), const_spec(bias1),
        const_spec(band2), const_spec(bias2),
        const_spec(band3), const_spec(bias3),
        const_spec(wp),
        pl.BlockSpec((1, seq, hd), lambda b: (b, 0, 0)),             # BN1d glue scale
        pl.BlockSpec((1, seq, hd), lambda b: (b, 0, 0)),             # BN1d glue shift
        const_spec(w1), const_spec(b1), const_spec(w2), const_spec(b2),
    ]

    pad_scratch = [pltpu.VMEM((seq * (hh + 2), (hh + 2) * ci), jnp.float32)
                   for (hh, ci, _co) in cfg]
    pm_rows = max(seq * (hh + 2) for (hh, _ci, _co) in cfg)
    pm_w = max((hh // 2) * co for (hh, _ci, co) in cfg)
    h_last, _, co_last = cfg[-1]
    scratch_shapes = pad_scratch + [
        pltpu.VMEM((pm_rows, pm_w), jnp.float32),
        pltpu.VMEM((seq * ((h_last + 2) // 2), (h_last // 2) * co_last), jnp.float32),
    ]

    kern = functools.partial(fused_bag_kernel, seq=seq, cfg=cfg)
    out = pl.pallas_call(
        kern,
        out_shape=jax.ShapeDtypeStruct((bsz, 1, nc), jnp.float32),
        grid=(bsz,),
        in_specs=in_specs,
        out_specs=pl.BlockSpec((1, 1, nc), lambda b: (b, 0, 0)),
        scratch_shapes=scratch_shapes,
        compiler_params=pltpu.CompilerParams(dimension_semantics=("parallel",)),
    )(xp, band1, bias1, band2, bias2, band3, bias3, wp, scale3, shift3,
      w1, b1, w2, b2)
    return out[:, 0, :]


# ------------------------------ parameters & tables ---------------------------

def init_params(key, hidden_dim=128, num_classes=2, image_size=16):
    keys = jax.random.split(key, 32)
    k = iter(keys)
    conv = []
    for cin, cout in [(3, 4), (4, 8), (8, 16)]:
        conv.append(dict(
            w=0.2 * jax.random.normal(next(k), (cout, cin, 3, 3), jnp.float32),
            b=0.1 * jax.random.normal(next(k), (cout,), jnp.float32),
            gamma=1.0 + 0.1 * jax.random.normal(next(k), (cout,), jnp.float32),
            beta=0.1 * jax.random.normal(next(k), (cout,), jnp.float32),
            mean=0.1 * jax.random.normal(next(k), (cout,), jnp.float32),
            var=jax.random.uniform(next(k), (cout,), jnp.float32, 0.5, 1.5),
        ))
    d_model = 16 * (image_size // 8) ** 2
    return dict(
        conv=conv,
        wp=0.1 * jax.random.normal(next(k), (d_model, hidden_dim), jnp.float32),
        bp=0.1 * jax.random.normal(next(k), (hidden_dim,), jnp.float32),
        g1=1.0 + 0.1 * jax.random.normal(next(k), (hidden_dim,), jnp.float32),
        be1=0.1 * jax.random.normal(next(k), (hidden_dim,), jnp.float32),
        rm1=0.1 * jax.random.normal(next(k), (hidden_dim,), jnp.float32),
        rv1=jax.random.uniform(next(k), (hidden_dim,), jnp.float32, 0.5, 1.5),
        w1=0.1 * jax.random.normal(next(k), (hidden_dim, hidden_dim // 4), jnp.float32),
        b1=0.1 * jax.random.normal(next(k), (hidden_dim // 4,), jnp.float32),
        w2=0.1 * jax.random.normal(next(k), (hidden_dim // 4, num_classes), jnp.float32),
        b2=0.1 * jax.random.normal(next(k), (num_classes,), jnp.float32),
        d_model=d_model, hidden_dim=hidden_dim, num_classes=num_classes,
        image_size=image_size,
    )


def build_extractor_tables(params, dtype=jnp.bfloat16):
    """Banded conv-weight matrices (BN2d folded, both W-phases merged along N)."""
    tables = []
    w_sp = params["image_size"]
    for layer in params["conv"]:
        w = np.asarray(layer["w"], np.float32)
        b = np.asarray(layer["b"], np.float32)
        gamma = np.asarray(layer["gamma"], np.float32)
        beta = np.asarray(layer["beta"], np.float32)
        mean = np.asarray(layer["mean"], np.float32)
        var = np.asarray(layer["var"], np.float32)
        cout, cin = w.shape[0], w.shape[1]
        scale = gamma / np.sqrt(var + EPS)
        shift = scale * (b - mean) + beta
        wh = w_sp // 2
        band = np.zeros((3, (w_sp + 2) * cin, 2 * wh * cout), np.float32)
        for phase in range(2):
            for dy in range(3):
                for dx in range(3):
                    blk = (w[:, :, dy, dx] * scale[:, None]).T     # (cin, cout)
                    for j in range(wh):
                        wi = 2 * j + phase + dx                    # padded input w index
                        col = phase * wh * cout + j * cout
                        band[dy, wi * cin:(wi + 1) * cin, col:col + cout] = blk
        bias_lane = np.tile(shift, 2 * wh).reshape(1, 2 * wh * cout).astype(np.float32)
        tables.append((jnp.asarray(band, dtype=dtype), jnp.asarray(bias_lane)))
        w_sp = wh
    return tables


def build_head_tables(params, bsz, seq):
    """Per-element affine for project-bias + BatchNorm1d (torch view-reinterpretation
    x.view(seq, hidden, batch) makes channel c = ((row*hidden + col) // batch) % hidden)."""
    n = bsz * seq
    hd = params["hidden_dim"]
    bp = np.asarray(params["bp"], np.float32)
    if seq > 1:
        c_idx = (np.arange(n * hd) // bsz) % hd
        g1 = np.asarray(params["g1"]); be1 = np.asarray(params["be1"])
        rm1 = np.asarray(params["rm1"]); rv1 = np.asarray(params["rv1"])
        s_flat = (g1 / np.sqrt(rv1 + EPS))[c_idx].reshape(n, hd)
        mean_flat = rm1[c_idx].reshape(n, hd)
        beta_flat = be1[c_idx].reshape(n, hd)
        scale_arr = s_flat.astype(np.float32)
        shift_arr = (s_flat * (bp[None, :] - mean_flat) + beta_flat).astype(np.float32)
    else:
        scale_arr = np.ones((n, hd), np.float32)
        shift_arr = np.broadcast_to(bp[None, :], (n, hd)).astype(np.float32).copy()
    return jnp.asarray(scale_arr), jnp.asarray(shift_arr)


# ------------------------------ pure-JAX reference ----------------------------

def reference_forward(x, params):
    bsz, seq, c, h, w = x.shape
    n = bsz * seq
    hd = params["hidden_dim"]
    xi = x.reshape(n, c, h, w)
    for layer in params["conv"]:
        xi = lax.conv_general_dilated(
            xi, layer["w"], window_strides=(1, 1), padding=((1, 1), (1, 1)),
            dimension_numbers=("NCHW", "OIHW", "NCHW"))
        xi = xi + layer["b"][None, :, None, None]
        scale = layer["gamma"] / jnp.sqrt(layer["var"] + EPS)
        xi = (xi - layer["mean"][None, :, None, None]) * scale[None, :, None, None] \
            + layer["beta"][None, :, None, None]
        xi = jnp.where(xi > 0, xi, NEG_SLOPE * xi)
        n_, c_, h_, w_ = xi.shape
        xi = xi.reshape(n_, c_, h_ // 2, 2, w_ // 2, 2).max(axis=(3, 5))
    feat = jnp.transpose(xi, (0, 2, 3, 1)).reshape(n, -1)   # (h, w, c) flatten = kernel layout
    proj = feat @ params["wp"] + params["bp"]
    if seq > 1:
        v = proj.reshape(seq, hd, bsz)
        scale = params["g1"] / jnp.sqrt(params["rv1"] + EPS)
        v = (v - params["rm1"][None, :, None]) * scale[None, :, None] \
            + params["be1"][None, :, None]
        proj = v.reshape(n, hd)
    y = proj.reshape(bsz, seq, hd)
    agg = jnp.min(y, axis=-2)                               # FeatureAggregator.MIN
    h1 = jnp.maximum(agg @ params["w1"] + params["b1"], 0.0)
    return h1 @ params["w2"] + params["b2"]


# ------------------------------ main -------------------------------------------

if __name__ == "__main__":
    B, S, IMG = 2, 4, 16
    key = jax.random.PRNGKey(0)
    kp, kx = jax.random.split(key)
    params = init_params(kp, hidden_dim=128, num_classes=2, image_size=IMG)
    conv_tables = build_extractor_tables(params)
    head_tables = build_head_tables(params, B, S)
    x = jax.random.uniform(kx, (B, S, 3, IMG, IMG), jnp.float32)

    out = jax.block_until_ready(
        bag_image_model_forward(x, params, conv_tables, head_tables))
    ref = jax.block_until_ready(reference_forward(x, params))
    np.testing.assert_allclose(np.asarray(out), np.asarray(ref), rtol=5e-2, atol=5e-2)
    print("KERNEL_OK")
</pallas_src>

<mosaic_0001>
module attributes {stable_mosaic.version = 11 : i64} {
  func.func @fused_bag_kernel(%arg0: i32, %arg1: memref<1x64x48xf32, #tpu.memory_space<vmem>>, %arg2: memref<3x54x64xbf16, #tpu.memory_space<vmem>>, %arg3: memref<1x64xf32, #tpu.memory_space<vmem>>, %arg4: memref<3x40x64xbf16, #tpu.memory_space<vmem>>, %arg5: memref<1x64xf32, #tpu.memory_space<vmem>>, %arg6: memref<3x48x64xbf16, #tpu.memory_space<vmem>>, %arg7: memref<1x64xf32, #tpu.memory_space<vmem>>, %arg8: memref<64x128xf32, #tpu.memory_space<vmem>>, %arg9: memref<1x4x128xf32, #tpu.memory_space<vmem>>, %arg10: memref<1x4x128xf32, #tpu.memory_space<vmem>>, %arg11: memref<128x32xf32, #tpu.memory_space<vmem>>, %arg12: memref<1x32xf32, #tpu.memory_space<vmem>>, %arg13: memref<32x2xf32, #tpu.memory_space<vmem>>, %arg14: memref<1x2xf32, #tpu.memory_space<vmem>>, %arg15: memref<1x1x2xf32, #tpu.memory_space<vmem>>, %arg16: memref<72x54xf32, #tpu.memory_space<vmem>>, %arg17: memref<40x40xf32, #tpu.memory_space<vmem>>, %arg18: memref<24x48xf32, #tpu.memory_space<vmem>>, %arg19: memref<72x32xf32, #tpu.memory_space<vmem>>, %arg20: memref<12x32xf32, #tpu.memory_space<vmem>>) attributes {dimension_semantics = [#tpu.dimension_semantics<parallel>], iteration_bounds = array<i64: 2>, scalar_prefetch = 0 : i64, scratch_operands = 5 : i64, tpu.core_type = #tpu.core_type<tc>, window_params = [{transform_indices = @transform_0, window_bounds = array<i64: 1, 64, 48>}, {pipeline_mode = #tpu.pipeline_mode<synchronous>, transform_indices = @transform_1, window_bounds = array<i64: 3, 54, 64>}, {pipeline_mode = #tpu.pipeline_mode<synchronous>, transform_indices = @transform_2, window_bounds = array<i64: 1, 64>}, {pipeline_mode = #tpu.pipeline_mode<synchronous>, transform_indices = @transform_3, window_bounds = array<i64: 3, 40, 64>}, {pipeline_mode = #tpu.pipeline_mode<synchronous>, transform_indices = @transform_4, window_bounds = array<i64: 1, 64>}, {pipeline_mode = #tpu.pipeline_mode<synchronous>, transform_indices = @transform_5, window_bounds = array<i64: 3, 48, 64>}, {pipeline_mode = #tpu.pipeline_mode<synchronous>, transform_indices = @transform_6, window_bounds = array<i64: 1, 64>}, {pipeline_mode = #tpu.pipeline_mode<synchronous>, transform_indices = @transform_7, window_bounds = array<i64: 64, 128>}, {transform_indices = @transform_8, window_bounds = array<i64: 1, 4, 128>}, {transform_indices = @transform_9, window_bounds = array<i64: 1, 4, 128>}, {pipeline_mode = #tpu.pipeline_mode<synchronous>, transform_indices = @transform_10, window_bounds = array<i64: 128, 32>}, {pipeline_mode = #tpu.pipeline_mode<synchronous>, transform_indices = @transform_11, window_bounds = array<i64: 1, 32>}, {pipeline_mode = #tpu.pipeline_mode<synchronous>, transform_indices = @transform_12, window_bounds = array<i64: 32, 2>}, {pipeline_mode = #tpu.pipeline_mode<synchronous>, transform_indices = @transform_13, window_bounds = array<i64: 1, 2>}, {transform_indices = @transform_14, window_bounds = array<i64: 1, 1, 2>}]} {
    %cst = arith.constant 0.000000e+00 : f32
    %0 = vector.broadcast %cst : f32 to vector<72x54xf32>
    %c0 = arith.constant 0 : index
    %c0_0 = arith.constant 0 : index
    %1 = vector.load %arg16[%c0, %c0_0] : memref<72x54xf32, #tpu.memory_space<vmem>>, vector<72x54xf32>
    tpu.vector_store %arg16[%c0, %c0_0], %0 {strides = array<i32>} : memref<72x54xf32, #tpu.memory_space<vmem>>, vector<72x54xf32>,
    %cst_1 = arith.constant 0.000000e+00 : f32
    %2 = vector.broadcast %cst_1 : f32 to vector<40x40xf32>
    %c0_2 = arith.constant 0 : index
    %c0_3 = arith.constant 0 : index
    %3 = vector.load %arg17[%c0_2, %c0_3] : memref<40x40xf32, #tpu.memory_space<vmem>>, vector<40x40xf32>
    tpu.vector_store %arg17[%c0_2, %c0_3], %2 {strides = array<i32>} : memref<40x40xf32, #tpu.memory_space<vmem>>, vector<40x40xf32>,
    %cst_4 = arith.constant 0.000000e+00 : f32
    %4 = vector.broadcast %cst_4 : f32 to vector<24x48xf32>
    %c0_5 = arith.constant 0 : index
    %c0_6 = arith.constant 0 : index
    %5 = vector.load %arg18[%c0_5, %c0_6] : memref<24x48xf32, #tpu.memory_space<vmem>>, vector<24x48xf32>
    tpu.vector_store %arg18[%c0_5, %c0_6], %4 {strides = array<i32>} : memref<24x48xf32, #tpu.memory_space<vmem>>, vector<24x48xf32>,
    %c0_7 = arith.constant 0 : index
    %c0_8 = arith.constant 0 : index
    %c0_9 = arith.constant 0 : index
    %6 = vector.load %arg1[%c0_7, %c0_8, %c0_9] : memref<1x64x48xf32, #tpu.memory_space<vmem>>, vector<1x64x48xf32>
    %7 = vector.shape_cast %6 : vector<1x64x48xf32> to vector<64x48xf32>
    %8 = vector.extract_strided_slice %7 {offsets = [0, 0], sizes = [16, 48], strides = [1, 1]} : vector<64x48xf32> to vector<16x48xf32>
    %c1 = arith.constant 1 : index
    %c3 = arith.constant 3 : index
    %9 = vector.load %arg16[%c1, %c3] : memref<72x54xf32, #tpu.memory_space<vmem>>, vector<16x48xf32>
    tpu.vector_store %arg16[%c1, %c3], %8 {strides = array<i32>} : memref<72x54xf32, #tpu.memory_space<vmem>>, vector<16x48xf32>,
    %10 = vector.extract_strided_slice %7 {offsets = [16, 0], sizes = [16, 48], strides = [1, 1]} : vector<64x48xf32> to vector<16x48xf32>
    %c19 = arith.constant 19 : index
    %c3_10 = arith.constant 3 : index
    %11 = vector.load %arg16[%c19, %c3_10] : memref<72x54xf32, #tpu.memory_space<vmem>>, vector<16x48xf32>
    tpu.vector_store %arg16[%c19, %c3_10], %10 {strides = array<i32>} : memref<72x54xf32, #tpu.memory_space<vmem>>, vector<16x48xf32>,
    %12 = vector.extract_strided_slice %7 {offsets = [32, 0], sizes = [16, 48], strides = [1, 1]} : vector<64x48xf32> to vector<16x48xf32>
    %c37 = arith.constant 37 : index
    %c3_11 = arith.constant 3 : index
    %13 = vector.load %arg16[%c37, %c3_11] : memref<72x54xf32, #tpu.memory_space<vmem>>, vector<16x48xf32>
    tpu.vector_store %arg16[%c37, %c3_11], %12 {strides = array<i32>} : memref<72x54xf32, #tpu.memory_space<vmem>>, vector<16x48xf32>,
    %14 = vector.extract_strided_slice %7 {offsets = [48, 0], sizes = [16, 48], strides = [1, 1]} : vector<64x48xf32> to vector<16x48xf32>
    %c55 = arith.constant 55 : index
    %c3_12 = arith.constant 3 : index
    %15 = vector.load %arg16[%c55, %c3_12] : memref<72x54xf32, #tpu.memory_space<vmem>>, vector<16x48xf32>
    tpu.vector_store %arg16[%c55, %c3_12], %14 {strides = array<i32>} : memref<72x54xf32, #tpu.memory_space<vmem>>, vector<16x48xf32>,
    %c0_13 = arith.constant 0 : index
    %c0_14 = arith.constant 0 : index
    %16 = vector.load %arg16[%c0_13, %c0_14] : memref<72x54xf32, #tpu.memory_space<vmem>>, vector<70x54xf32>
    %17 = arith.truncf %16 : vector<70x54xf32> to vector<70x54xbf16>
    %c0_15 = arith.constant 0 : index
    %c0_16 = arith.constant 0 : index
    %c0_17 = arith.constant 0 : index
    %18 = vector.load %arg2[%c0_15, %c0_16, %c0_17] : memref<3x54x64xbf16, #tpu.memory_space<vmem>>, vector<1x54x64xbf16>
    %19 = vector.shape_cast %18 : vector<1x54x64xbf16> to vector<54x64xbf16>
    %cst_18 = arith.constant dense<0.000000e+00> : vector<70x64xf32>
    %20 = tpu.matmul %17, %19, %cst_18 {dimension_numbers = #tpu.dot_dimension_numbers<[1], [0], [0], [1], [0, 0, 1, 1], [], []>} : vector<70x54xbf16>, vector<54x64xbf16>, vector<70x64xf32> -> vector<70x64xf32>
    %c1_19 = arith.constant 1 : index
    %c0_20 = arith.constant 0 : index
    %21 = vector.load %arg16[%c1_19, %c0_20] : memref<72x54xf32, #tpu.memory_space<vmem>>, vector<70x54xf32>
    %22 = arith.truncf %21 : vector<70x54xf32> to vector<70x54xbf16>
    %c1_21 = arith.constant 1 : index
    %c0_22 = arith.constant 0 : index
    %c0_23 = arith.constant 0 : index
    %23 = vector.load %arg2[%c1_21, %c0_22, %c0_23] : memref<3x54x64xbf16, #tpu.memory_space<vmem>>, vector<1x54x64xbf16>
    %24 = vector.shape_cast %23 : vector<1x54x64xbf16> to vector<54x64xbf16>
    %cst_24 = arith.constant dense<0.000000e+00> : vector<70x64xf32>
    %25 = tpu.matmul %22, %24, %cst_24 {dimension_numbers = #tpu.dot_dimension_numbers<[1], [0], [0], [1], [0, 0, 1, 1], [], []>} : vector<70x54xbf16>, vector<54x64xbf16>, vector<70x64xf32> -> vector<70x64xf32>
    %26 = arith.addf %20, %25 : vector<70x64xf32>
    %c2 = arith.constant 2 : index
    %c0_25 = arith.constant 0 : index
    %27 = vector.load %arg16[%c2, %c0_25] : memref<72x54xf32, #tpu.memory_space<vmem>>, vector<70x54xf32>
    %28 = arith.truncf %27 : vector<70x54xf32> to vector<70x54xbf16>
    %c2_26 = arith.constant 2 : index
    %c0_27 = arith.constant 0 : index
    %c0_28 = arith.constant 0 : index
    %29 = vector.load %arg2[%c2_26, %c0_27, %c0_28] : memref<3x54x64xbf16, #tpu.memory_space<vmem>>, vector<1x54x64xbf16>
    %30 = vector.shape_cast %29 : vector<1x54x64xbf16> to vector<54x64xbf16>
    %cst_29 = arith.constant dense<0.000000e+00> : vector<70x64xf32>
    %31 = tpu.matmul %28, %30, %cst_29 {dimension_numbers = #tpu.dot_dimension_numbers<[1], [0], [0], [1], [0, 0, 1, 1], [], []>} : vector<70x54xbf16>, vector<54x64xbf16>, vector<70x64xf32> -> vector<70x64xf32>
    %32 = arith.addf %26, %31 : vector<70x64xf32>
    %c0_30 = arith.constant 0 : index
    %c0_31 = arith.constant 0 : index
    %33 = vector.load %arg3[%c0_30, %c0_31] : memref<1x64xf32, #tpu.memory_space<vmem>>, vector<1x64xf32>
    %34 = vector.broadcast %33 : vector<1x64xf32> to vector<70x64xf32>
    %35 = arith.addf %32, %34 : vector<70x64xf32>
    %cst_32 = arith.constant 0.000000e+00 : f32
    %36 = vector.broadcast %cst_32 : f32 to vector<70x64xf32>
    %37 = arith.cmpf ogt, %35, %36 : vector<70x64xf32>
    %cst_33 = arith.constant 0.00999999977 : f32
    %38 = vector.broadcast %cst_33 : f32 to vector<70x64xf32>
    %39 = arith.mulf %38, %35 : vector<70x64xf32>
    %40 = arith.select %37, %35, %39 : vector<70x64xi1>, vector<70x64xf32>
    %41 = vector.extract_strided_slice %40 {offsets = [0, 0], sizes = [70, 32], strides = [1, 1]} : vector<70x64xf32> to vector<70x32xf32>
    %42 = vector.extract_strided_slice %40 {offsets = [0, 32], sizes = [70, 32], strides = [1, 1]} : vector<70x64xf32> to vector<70x32xf32>
    %43 = arith.maximumf %41, %42 : vector<70x32xf32>
    %c0_34 = arith.constant 0 : index
    %c0_35 = arith.constant 0 : index
    %44 = vector.load %arg19[%c0_34, %c0_35] : memref<72x32xf32, #tpu.memory_space<vmem>>, vector<70x32xf32>
    tpu.vector_store %arg19[%c0_34, %c0_35], %43 {strides = array<i32>} : memref<72x32xf32, #tpu.memory_space<vmem>>, vector<70x32xf32>,
    %c0_36 = arith.constant 0 : index
    %c0_37 = arith.constant 0 : index
    %45 = tpu.strided_load %arg19[%c0_36, %c0_37] {strides = array<i32: 2, 1>} : memref<72x32xf32, #tpu.memory_space<vmem>>, vector<35x32xf32>
    %c1_38 = arith.constant 1 : index
    %c0_39 = arith.constant 0 : index
    %46 = tpu.strided_load %arg19[%c1_38, %c0_39] {strides = array<i32: 2, 1>} : memref<72x32xf32, #tpu.memory_space<vmem>>, vector<35x32xf32>
    %47 = arith.maximumf %45, %46 : vector<35x32xf32>
    %48 = vector.extract_strided_slice %47 {offsets = [0, 0], sizes = [8, 32], strides = [1, 1]} : vector<35x32xf32> to vector<8x32xf32>
    %c1_40 = arith.constant 1 : index
    %c4 = arith.constant 4 : index
    %49 = vector.load %arg17[%c1_40, %c4] : memref<40x40xf32, #tpu.memory_space<vmem>>, vector<8x32xf32>
    tpu.vector_store %arg17[%c1_40, %c4], %48 {strides = array<i32>} : memref<40x40xf32, #tpu.memory_space<vmem>>, vector<8x32xf32>,
    %50 = vector.extract_strided_slice %47 {offsets = [9, 0], sizes = [8, 32], strides = [1, 1]} : vector<35x32xf32> to vector<8x32xf32>
    %c11 = arith.constant 11 : index
    %c4_41 = arith.constant 4 : index
    %51 = vector.load %arg17[%c11, %c4_41] : memref<40x40xf32, #tpu.memory_space<vmem>>, vector<8x32xf32>
    tpu.vector_store %arg17[%c11, %c4_41], %50 {strides = array<i32>} : memref<40x40xf32, #tpu.memory_space<vmem>>, vector<8x32xf32>,
    %52 = vector.extract_strided_slice %47 {offsets = [18, 0], sizes = [8, 32], strides = [1, 1]} : vector<35x32xf32> to vector<8x32xf32>
    %c21 = arith.constant 21 : index
    %c4_42 = arith.constant 4 : index
    %53 = vector.load %arg17[%c21, %c4_42] : memref<40x40xf32, #tpu.memory_space<vmem>>, vector<8x32xf32>
    tpu.vector_store %arg17[%c21, %c4_42], %52 {strides = array<i32>} : memref<40x40xf32, #tpu.memory_space<vmem>>, vector<8x32xf32>,
    %54 = vector.extract_strided_slice %47 {offsets = [27, 0], sizes = [8, 32], strides = [1, 1]} : vector<35x32xf32> to vector<8x32xf32>
    %c31 = arith.constant 31 : index
    %c4_43 = arith.constant 4 : index
    %55 = vector.load %arg17[%c31, %c4_43] : memref<40x40xf32, #tpu.memory_space<vmem>>, vector<8x32xf32>
    tpu.vector_store %arg17[%c31, %c4_43], %54 {strides = array<i32>} : memref<40x40xf32, #tpu.memory_space<vmem>>, vector<8x32xf32>,
    %c0_44 = arith.constant 0 : index
    %c0_45 = arith.constant 0 : index
    %56 = vector.load %arg17[%c0_44, %c0_45] : memref<40x40xf32, #tpu.memory_space<vmem>>, vector<38x40xf32>
    %57 = arith.truncf %56 : vector<38x40xf32> to vector<38x40xbf16>
    %c0_46 = arith.constant 0 : index
    %c0_47 = arith.constant 0 : index
    %c0_48 = arith.constant 0 : index
    %58 = vector.load %arg4[%c0_46, %c0_47, %c0_48] : memref<3x40x64xbf16, #tpu.memory_space<vmem>>, vector<1x40x64xbf16>
    %59 = vector.shape_cast %58 : vector<1x40x64xbf16> to vector<40x64xbf16>
    %cst_49 = arith.constant dense<0.000000e+00> : vector<38x64xf32>
    %60 = tpu.matmul %57, %59, %cst_49 {dimension_numbers = #tpu.dot_dimension_numbers<[1], [0], [0], [1], [0, 0, 1, 1], [], []>} : vector<38x40xbf16>, vector<40x64xbf16>, vector<38x64xf32> -> vector<38x64xf32>
    %c1_50 = arith.constant 1 : index
    %c0_51 = arith.constant 0 : index
    %61 = vector.load %arg17[%c1_50, %c0_51] : memref<40x40xf32, #tpu.memory_space<vmem>>, vector<38x40xf32>
    %62 = arith.truncf %61 : vector<38x40xf32> to vector<38x40xbf16>
    %c1_52 = arith.constant 1 : index
    %c0_53 = arith.constant 0 : index
    %c0_54 = arith.constant 0 : index
    %63 = vector.load %arg4[%c1_52, %c0_53, %c0_54] : memref<3x40x64xbf16, #tpu.memory_space<vmem>>, vector<1x40x64xbf16>
    %64 = vector.shape_cast %63 : vector<1x40x64xbf16> to vector<40x64xbf16>
    %cst_55 = arith.constant dense<0.000000e+00> : vector<38x64xf32>
    %65 = tpu.matmul %62, %64, %cst_55 {dimension_numbers = #tpu.dot_dimension_numbers<[1], [0], [0], [1], [0, 0, 1, 1], [], []>} : vector<38x40xbf16>, vector<40x64xbf16>, vector<38x64xf32> -> vector<38x64xf32>
    %66 = arith.addf %60, %65 : vector<38x64xf32>
    %c2_56 = arith.constant 2 : index
    %c0_57 = arith.constant 0 : index
    %67 = vector.load %arg17[%c2_56, %c0_57] : memref<40x40xf32, #tpu.memory_space<vmem>>, vector<38x40xf32>
    %68 = arith.truncf %67 : vector<38x40xf32> to vector<38x40xbf16>
    %c2_58 = arith.constant 2 : index
    %c0_59 = arith.constant 0 : index
    %c0_60 = arith.constant 0 : index
    %69 = vector.load %arg4[%c2_58, %c0_59, %c0_60] : memref<3x40x64xbf16, #tpu.memory_space<vmem>>, vector<1x40x64xbf16>
    %70 = vector.shape_cast %69 : vector<1x40x64xbf16> to vector<40x64xbf16>
    %cst_61 = arith.constant dense<0.000000e+00> : vector<38x64xf32>
    %71 = tpu.matmul %68, %70, %cst_61 {dimension_numbers = #tpu.dot_dimension_numbers<[1], [0], [0], [1], [0, 0, 1, 1], [], []>} : vector<38x40xbf16>, vector<40x64xbf16>, vector<38x64xf32> -> vector<38x64xf32>
    %72 = arith.addf %66, %71 : vector<38x64xf32>
    %c0_62 = arith.constant 0 : index
    %c0_63 = arith.constant 0 : index
    %73 = vector.load %arg5[%c0_62, %c0_63] : memref<1x64xf32, #tpu.memory_space<vmem>>, vector<1x64xf32>
    %74 = vector.broadcast %73 : vector<1x64xf32> to vector<38x64xf32>
    %75 = arith.addf %72, %74 : vector<38x64xf32>
    %cst_64 = arith.constant 0.000000e+00 : f32
    %76 = vector.broadcast %cst_64 : f32 to vector<38x64xf32>
    %77 = arith.cmpf ogt, %75, %76 : vector<38x64xf32>
    %cst_65 = arith.constant 0.00999999977 : f32
    %78 = vector.broadcast %cst_65 : f32 to vector<38x64xf32>
    %79 = arith.mulf %78, %75 : vector<38x64xf32>
    %80 = arith.select %77, %75, %79 : vector<38x64xi1>, vector<38x64xf32>
    %81 = vector.extract_strided_slice %80 {offsets = [0, 0], sizes = [38, 32], strides = [1, 1]} : vector<38x64xf32> to vector<38x32xf32>
    %82 = vector.extract_strided_slice %80 {offsets = [0, 32], sizes = [38, 32], strides = [1, 1]} : vector<38x64xf32> to vector<38x32xf32>
    %83 = arith.maximumf %81, %82 : vector<38x32xf32>
    %c0_66 = arith.constant 0 : index
    %c0_67 = arith.constant 0 : index
    %84 = vector.load %arg19[%c0_66, %c0_67] : memref<72x32xf32, #tpu.memory_space<vmem>>, vector<38x32xf32>
    tpu.vector_store %arg19[%c0_66, %c0_67], %83 {strides = array<i32>} : memref<72x32xf32, #tpu.memory_space<vmem>>, vector<38x32xf32>,
    %c0_68 = arith.constant 0 : index
    %c0_69 = arith.constant 0 : index
    %85 = tpu.strided_load %arg19[%c0_68, %c0_69] {strides = array<i32: 2, 1>} : memref<72x32xf32, #tpu.memory_space<vmem>>, vector<19x32xf32>
    %c1_70 = arith.constant 1 : index
    %c0_71 = arith.constant 0 : index
    %86 = tpu.strided_load %arg19[%c1_70, %c0_71] {strides = array<i32: 2, 1>} : memref<72x32xf32, #tpu.memory_space<vmem>>, vector<19x32xf32>
    %87 = arith.maximumf %85, %86 : vector<19x32xf32>
    %88 = vector.extract_strided_slice %87 {offsets = [0, 0], sizes = [4, 32], strides = [1, 1]} : vector<19x32xf32> to vector<4x32xf32>
    %c1_72 = arith.constant 1 : index
    %c8 = arith.constant 8 : index
    %89 = vector.load %arg18[%c1_72, %c8] : memref<24x48xf32, #tpu.memory_space<vmem>>, vector<4x32xf32>
    tpu.vector_store %arg18[%c1_72, %c8], %88 {strides = array<i32>} : memref<24x48xf32, #tpu.memory_space<vmem>>, vector<4x32xf32>,
    %90 = vector.extract_strided_slice %87 {offsets = [5, 0], sizes = [4, 32], strides = [1, 1]} : vector<19x32xf32> to vector<4x32xf32>
    %c7 = arith.constant 7 : index
    %c8_73 = arith.constant 8 : index
    %91 = vector.load %arg18[%c7, %c8_73] : memref<24x48xf32, #tpu.memory_space<vmem>>, vector<4x32xf32>
    tpu.vector_store %arg18[%c7, %c8_73], %90 {strides = array<i32>} : memref<24x48xf32, #tpu.memory_space<vmem>>, vector<4x32xf32>,
    %92 = vector.extract_strided_slice %87 {offsets = [10, 0], sizes = [4, 32], strides = [1, 1]} : vector<19x32xf32> to vector<4x32xf32>
    %c13 = arith.constant 13 : index
    %c8_74 = arith.constant 8 : index
    %93 = vector.load %arg18[%c13, %c8_74] : memref<24x48xf32, #tpu.memory_space<vmem>>, vector<4x32xf32>
    tpu.vector_store %arg18[%c13, %c8_74], %92 {strides = array<i32>} : memref<24x48xf32, #tpu.memory_space<vmem>>, vector<4x32xf32>,
    %94 = vector.extract_strided_slice %87 {offsets = [15, 0], sizes = [4, 32], strides = [1, 1]} : vector<19x32xf32> to vector<4x32xf32>
    %c19_75 = arith.constant 19 : index
    %c8_76 = arith.constant 8 : index
    %95 = vector.load %arg18[%c19_75, %c8_76] : memref<24x48xf32, #tpu.memory_space<vmem>>, vector<4x32xf32>
    tpu.vector_store %arg18[%c19_75, %c8_76], %94 {strides = array<i32>} : memref<24x48xf32, #tpu.memory_space<vmem>>, vector<4x32xf32>,
    %c0_77 = arith.constant 0 : index
    %c0_78 = arith.constant 0 : index
    %96 = vector.load %arg18[%c0_77, %c0_78] : memref<24x48xf32, #tpu.memory_space<vmem>>, vector<22x48xf32>
    %97 = arith.truncf %96 : vector<22x48xf32> to vector<22x48xbf16>
    %c0_79 = arith.constant 0 : index
    %c0_80 = arith.constant 0 : index
    %c0_81 = arith.constant 0 : index
    %98 = vector.load %arg6[%c0_79, %c0_80, %c0_81] : memref<3x48x64xbf16, #tpu.memory_space<vmem>>, vector<1x48x64xbf16>
    %99 = vector.shape_cast %98 : vector<1x48x64xbf16> to vector<48x64xbf16>
    %cst_82 = arith.constant dense<0.000000e+00> : vector<22x64xf32>
    %100 = tpu.matmul %97, %99, %cst_82 {dimension_numbers = #tpu.dot_dimension_numbers<[1], [0], [0], [1], [0, 0, 1, 1], [], []>} : vector<22x48xbf16>, vector<48x64xbf16>, vector<22x64xf32> -> vector<22x64xf32>
    %c1_83 = arith.constant 1 : index
    %c0_84 = arith.constant 0 : index
    %101 = vector.load %arg18[%c1_83, %c0_84] : memref<24x48xf32, #tpu.memory_space<vmem>>, vector<22x48xf32>
    %102 = arith.truncf %101 : vector<22x48xf32> to vector<22x48xbf16>
    %c1_85 = arith.constant 1 : index
    %c0_86 = arith.constant 0 : index
    %c0_87 = arith.constant 0 : index
    %103 = vector.load %arg6[%c1_85, %c0_86, %c0_87] : memref<3x48x64xbf16, #tpu.memory_space<vmem>>, vector<1x48x64xbf16>
    %104 = vector.shape_cast %103 : vector<1x48x64xbf16> to vector<48x64xbf16>
    %cst_88 = arith.constant dense<0.000000e+00> : vector<22x64xf32>
    %105 = tpu.matmul %102, %104, %cst_88 {dimension_numbers = #tpu.dot_dimension_numbers<[1], [0], [0], [1], [0, 0, 1, 1], [], []>} : vector<22x48xbf16>, vector<48x64xbf16>, vector<22x64xf32> -> vector<22x64xf32>
    %106 = arith.addf %100, %105 : vector<22x64xf32>
    %c2_89 = arith.constant 2 : index
    %c0_90 = arith.constant 0 : index
    %107 = vector.load %arg18[%c2_89, %c0_90] : memref<24x48xf32, #tpu.memory_space<vmem>>, vector<22x48xf32>
    %108 = arith.truncf %107 : vector<22x48xf32> to vector<22x48xbf16>
    %c2_91 = arith.constant 2 : index
    %c0_92 = arith.constant 0 : index
    %c0_93 = arith.constant 0 : index
    %109 = vector.load %arg6[%c2_91, %c0_92, %c0_93] : memref<3x48x64xbf16, #tpu.memory_space<vmem>>, vector<1x48x64xbf16>
    %110 = vector.shape_cast %109 : vector<1x48x64xbf16> to vector<48x64xbf16>
    %cst_94 = arith.constant dense<0.000000e+00> : vector<22x64xf32>
    %111 = tpu.matmul %108, %110, %cst_94 {dimension_numbers = #tpu.dot_dimension_numbers<[1], [0], [0], [1], [0, 0, 1, 1], [], []>} : vector<22x48xbf16>, vector<48x64xbf16>, vector<22x64xf32> -> vector<22x64xf32>
    %112 = arith.addf %106, %111 : vector<22x64xf32>
    %c0_95 = arith.constant 0 : index
    %c0_96 = arith.constant 0 : index
    %113 = vector.load %arg7[%c0_95, %c0_96] : memref<1x64xf32, #tpu.memory_space<vmem>>, vector<1x64xf32>
    %114 = vector.broadcast %113 : vector<1x64xf32> to vector<22x64xf32>
    %115 = arith.addf %112, %114 : vector<22x64xf32>
    %cst_97 = arith.constant 0.000000e+00 : f32
    %116 = vector.broadcast %cst_97 : f32 to vector<22x64xf32>
    %117 = arith.cmpf ogt, %115, %116 : vector<22x64xf32>
    %cst_98 = arith.constant 0.00999999977 : f32
    %118 = vector.broadcast %cst_98 : f32 to vector<22x64xf32>
    %119 = arith.mulf %118, %115 : vector<22x64xf32>
    %120 = arith.select %117, %115, %119 : vector<22x64xi1>, vector<22x64xf32>
    %121 = vector.extract_strided_slice %120 {offsets = [0, 0], sizes = [22, 32], strides = [1, 1]} : vector<22x64xf32> to vector<22x32xf32>
    %122 = vector.extract_strided_slice %120 {offsets = [0, 32], sizes = [22, 32], strides = [1, 1]} : vector<22x64xf32> to vector<22x32xf32>
    %123 = arith.maximumf %121, %122 : vector<22x32xf32>
    %c0_99 = arith.constant 0 : index
    %c0_100 = arith.constant 0 : index
    %124 = vector.load %arg19[%c0_99, %c0_100] : memref<72x32xf32, #tpu.memory_space<vmem>>, vector<22x32xf32>
    tpu.vector_store %arg19[%c0_99, %c0_100], %123 {strides = array<i32>} : memref<72x32xf32, #tpu.memory_space<vmem>>, vector<22x32xf32>,
    %c0_101 = arith.constant 0 : index
    %c0_102 = arith.constant 0 : index
    %125 = tpu.strided_load %arg19[%c0_101, %c0_102] {strides = array<i32: 2, 1>} : memref<72x32xf32, #tpu.memory_space<vmem>>, vector<11x32xf32>
    %c1_103 = arith.constant 1 : index
    %c0_104 = arith.constant 0 : index
    %126 = tpu.strided_load %arg19[%c1_103, %c0_104] {strides = array<i32: 2, 1>} : memref<72x32xf32, #tpu.memory_space<vmem>>, vector<11x32xf32>
    %127 = arith.maximumf %125, %126 : vector<11x32xf32>
    %c0_105 = arith.constant 0 : index
    %c0_106 = arith.constant 0 : index
    %128 = vector.load %arg20[%c0_105, %c0_106] : memref<12x32xf32, #tpu.memory_space<vmem>>, vector<11x32xf32>
    tpu.vector_store %arg20[%c0_105, %c0_106], %127 {strides = array<i32>} : memref<12x32xf32, #tpu.memory_space<vmem>>, vector<11x32xf32>,
    %c0_107 = arith.constant 0 : index
    %c0_108 = arith.constant 0 : index
    %129 = tpu.strided_load %arg20[%c0_107, %c0_108] {strides = array<i32: 3, 1>} : memref<12x32xf32, #tpu.memory_space<vmem>>, vector<4x32xf32>
    %c1_109 = arith.constant 1 : index
    %c0_110 = arith.constant 0 : index
    %130 = tpu.strided_load %arg20[%c1_109, %c0_110] {strides = array<i32: 3, 1>} : memref<12x32xf32, #tpu.memory_space<vmem>>, vector<4x32xf32>
    %131 = tpu.concatenate %129, %130 in 1 : vector<4x32xf32>, vector<4x32xf32> -> vector<4x64xf32>
    %c0_111 = arith.constant 0 : index
    %c0_112 = arith.constant 0 : index
    %132 = vector.load %arg8[%c0_111, %c0_112] : memref<64x128xf32, #tpu.memory_space<vmem>>, vector<64x128xf32>
    %cst_113 = arith.constant dense<0.000000e+00> : vector<4x128xf32>
    %133 = tpu.matmul %131, %132, %cst_113 {dimension_numbers = #tpu.dot_dimension_numbers<[1], [0], [0], [1], [0, 0, 1, 1], [], []>} : vector<4x64xf32>, vector<64x128xf32>, vector<4x128xf32> -> vector<4x128xf32>
    %c0_114 = arith.constant 0 : index
    %c0_115 = arith.constant 0 : index
    %c0_116 = arith.constant 0 : index
    %134 = vector.load %arg9[%c0_114, %c0_115, %c0_116] : memref<1x4x128xf32, #tpu.memory_space<vmem>>, vector<1x4x128xf32>
    %135 = vector.shape_cast %134 : vector<1x4x128xf32> to vector<4x128xf32>
    %136 = arith.mulf %133, %135 : vector<4x128xf32>
    %c0_117 = arith.constant 0 : index
    %c0_118 = arith.constant 0 : index
    %c0_119 = arith.constant 0 : index
    %137 = vector.load %arg10[%c0_117, %c0_118, %c0_119] : memref<1x4x128xf32, #tpu.memory_space<vmem>>, vector<1x4x128xf32>
    %138 = vector.shape_cast %137 : vector<1x4x128xf32> to vector<4x128xf32>
    %139 = arith.addf %136, %138 : vector<4x128xf32>
    %cst_120 = arith.constant dense<0x7F800000> : vector<128xf32>
    %140 = vector.multi_reduction <minimumf>, %139, %cst_120 [0] : vector<4x128xf32> to vector<128xf32>
    %141 = vector.shape_cast %140 : vector<128xf32> to vector<1x128xf32>
    %c0_121 = arith.constant 0 : index
    %c0_122 = arith.constant 0 : index
    %142 = vector.load %arg11[%c0_121, %c0_122] : memref<128x32xf32, #tpu.memory_space<vmem>>, vector<128x32xf32>
    %cst_123 = arith.constant dense<0.000000e+00> : vector<1x32xf32>
    %143 = tpu.matmul %141, %142, %cst_123 {dimension_numbers = #tpu.dot_dimension_numbers<[1], [0], [0], [1], [0, 0, 1, 1], [], []>} : vector<1x128xf32>, vector<128x32xf32>, vector<1x32xf32> -> vector<1x32xf32>
    %c0_124 = arith.constant 0 : index
    %c0_125 = arith.constant 0 : index
    %144 = vector.load %arg12[%c0_124, %c0_125] : memref<1x32xf32, #tpu.memory_space<vmem>>, vector<1x32xf32>
    %145 = arith.addf %143, %144 : vector<1x32xf32>
    %cst_126 = arith.constant 0.000000e+00 : f32
    %146 = vector.broadcast %cst_126 : f32 to vector<1x32xf32>
    %147 = arith.maximumf %145, %146 : vector<1x32xf32>
    %c0_127 = arith.constant 0 : index
    %c0_128 = arith.constant 0 : index
    %148 = vector.load %arg13[%c0_127, %c0_128] : memref<32x2xf32, #tpu.memory_space<vmem>>, vector<32x2xf32>
    %cst_129 = arith.constant dense<0.000000e+00> : vector<1x2xf32>
    %149 = tpu.matmul %147, %148, %cst_129 {dimension_numbers = #tpu.dot_dimension_numbers<[1], [0], [0], [1], [0, 0, 1, 1], [], []>} : vector<1x32xf32>, vector<32x2xf32>, vector<1x2xf32> -> vector<1x2xf32>
    %c0_130 = arith.constant 0 : index
    %c0_131 = arith.constant 0 : index
    %150 = vector.load %arg14[%c0_130, %c0_131] : memref<1x2xf32, #tpu.memory_space<vmem>>, vector<1x2xf32>
    %151 = arith.addf %149, %150 : vector<1x2xf32>
    %c0_132 = arith.constant 0 : index
    %c0_133 = arith.constant 0 : index
    %c0_134 = arith.constant 0 : index
    %152 = vector.load %arg15[%c0_132, %c0_133, %c0_134] : memref<1x1x2xf32, #tpu.memory_space<vmem>>, vector<1x1x2xf32>
    %153 = vector.shape_cast %152 : vector<1x1x2xf32> to vector<1x2xf32>
    %154 = vector.shape_cast %151 : vector<1x2xf32> to vector<1x1x2xf32>
    tpu.vector_store %arg15[%c0_132, %c0_133, %c0_134], %154 {strides = array<i32>} : memref<1x1x2xf32, #tpu.memory_space<vmem>>, vector<1x1x2xf32>,
    return
  }
  func.func @transform_0(%arg0: i32) -> (i32, i32, i32) {
    %c0_i32 = arith.constant 0 : i32
    %c0_i32_0 = arith.constant 0 : i32
    %c0_i32_1 = arith.constant 0 : i32
    return %arg0, %c0_i32, %c0_i32_0 : i32, i32, i32
  }
  func.func @transform_1(%arg0: i32) -> (i32, i32, i32) {
    %c0_i32 = arith.constant 0 : i32
    %c0_i32_0 = arith.constant 0 : i32
    %c0_i32_1 = arith.constant 0 : i32
    %c0_i32_2 = arith.constant 0 : i32
    return %c0_i32, %c0_i32_0, %c0_i32_1 : i32, i32, i32
  }
  func.func @transform_2(%arg0: i32) -> (i32, i32) {
    %c0_i32 = arith.constant 0 : i32
    %c0_i32_0 = arith.constant 0 : i32
    %c0_i32_1 = arith.constant 0 : i32
    return %c0_i32, %c0_i32_0 : i32, i32
  }
  func.func @transform_3(%arg0: i32) -> (i32, i32, i32) {
    %c0_i32 = arith.constant 0 : i32
    %c0_i32_0 = arith.constant 0 : i32
    %c0_i32_1 = arith.constant 0 : i32
    %c0_i32_2 = arith.constant 0 : i32
    return %c0_i32, %c0_i32_0, %c0_i32_1 : i32, i32, i32
  }
  func.func @transform_4(%arg0: i32) -> (i32, i32) {
    %c0_i32 = arith.constant 0 : i32
    %c0_i32_0 = arith.constant 0 : i32
    %c0_i32_1 = arith.constant 0 : i32
    return %c0_i32, %c0_i32_0 : i32, i32
  }
  func.func @transform_5(%arg0: i32) -> (i32, i32, i32) {
    %c0_i32 = arith.constant 0 : i32
    %c0_i32_0 = arith.constant 0 : i32
    %c0_i32_1 = arith.constant 0 : i32
    %c0_i32_2 = arith.constant 0 : i32
    return %c0_i32, %c0_i32_0, %c0_i32_1 : i32, i32, i32
  }
  func.func @transform_6(%arg0: i32) -> (i32, i32) {
    %c0_i32 = arith.constant 0 : i32
    %c0_i32_0 = arith.constant 0 : i32
    %c0_i32_1 = arith.constant 0 : i32
    return %c0_i32, %c0_i32_0 : i32, i32
  }
  func.func @transform_7(%arg0: i32) -> (i32, i32) {
    %c0_i32 = arith.constant 0 : i32
    %c0_i32_0 = arith.constant 0 : i32
    %c0_i32_1 = arith.constant 0 : i32
    return %c0_i32, %c0_i32_0 : i32, i32
  }
  func.func @transform_8(%arg0: i32) -> (i32, i32, i32) {
    %c0_i32 = arith.constant 0 : i32
    %c0_i32_0 = arith.constant 0 : i32
    %c0_i32_1 = arith.constant 0 : i32
    return %arg0, %c0_i32, %c0_i32_0 : i32, i32, i32
  }
  func.func @transform_9(%arg0: i32) -> (i32, i32, i32) {
    %c0_i32 = arith.constant 0 : i32
    %c0_i32_0 = arith.constant 0 : i32
    %c0_i32_1 = arith.constant 0 : i32
    return %arg0, %c0_i32, %c0_i32_0 : i32, i32, i32
  }
  func.func @transform_10(%arg0: i32) -> (i32, i32) {
    %c0_i32 = arith.constant 0 : i32
    %c0_i32_0 = arith.constant 0 : i32
    %c0_i32_1 = arith.constant 0 : i32
    return %c0_i32, %c0_i32_0 : i32, i32
  }
  func.func @transform_11(%arg0: i32) -> (i32, i32) {
    %c0_i32 = arith.constant 0 : i32
    %c0_i32_0 = arith.constant 0 : i32
    %c0_i32_1 = arith.constant 0 : i32
    return %c0_i32, %c0_i32_0 : i32, i32
  }
  func.func @transform_12(%arg0: i32) -> (i32, i32) {
    %c0_i32 = arith.constant 0 : i32
    %c0_i32_0 = arith.constant 0 : i32
    %c0_i32_1 = arith.constant 0 : i32
    return %c0_i32, %c0_i32_0 : i32, i32
  }
  func.func @transform_13(%arg0: i32) -> (i32, i32) {
    %c0_i32 = arith.constant 0 : i32
    %c0_i32_0 = arith.constant 0 : i32
    %c0_i32_1 = arith.constant 0 : i32
    return %c0_i32, %c0_i32_0 : i32, i32
  }
  func.func @transform_14(%arg0: i32) -> (i32, i32, i32) {
    %c0_i32 = arith.constant 0 : i32
    %c0_i32_0 = arith.constant 0 : i32
    %c0_i32_1 = arith.constant 0 : i32
    return %arg0, %c0_i32, %c0_i32_0 : i32, i32, i32
  }
}

</mosaic_0001>

<bundles_post_ra>
// kernel: tpu_custom_call.1
= control target key start
LH: loop header
LB: loop body
LE: loop exit
PB: predicated region body
PF: predicated region fallthrough
CT: control target
= control target key end

     0   :  { %s3468_s0 = inlined_call_operand.vmem [shape: f32[2,64,48], index: 0, kind: input, shape index: {}]   ;;  %s3469_s1 = inlined_call_operand.vmem [shape: bf16[3,54,64], index: 1, kind: input, shape index: {}]   ;;  %s3470_s2 = inlined_call_operand.vmem [shape: f32[1,64], index: 2, kind: input, shape index: {}]   ;;  %s3471_s3 = inlined_call_operand.vmem [shape: bf16[3,40,64], index: 3, kind: input, shape index: {}]   ;;  %s3472_s4 = inlined_call_operand.vmem [shape: f32[1,64], index: 4, kind: input, shape index: {}]   ;;  %s3473_s5 = inlined_call_operand.vmem [shape: bf16[3,48,64], index: 5, kind: input, shape index: {}]   ;;  %s3474_s6 = inlined_call_operand.vmem [shape: f32[1,64], index: 6, kind: input, shape index: {}]   ;;  %s3475_s7 = inlined_call_operand.vmem [shape: f32[64,128], index: 7, kind: input, shape index: {}]   ;;  %s3476_s8 = inlined_call_operand.vmem [shape: f32[2,4,128], index: 8, kind: input, shape index: {}]   ;;  %s3477_s9 = inlined_call_operand.vmem [shape: f32[2,4,128], index: 9, kind: input, shape index: {}]   ;;  %s3478_s10 = inlined_call_operand.vmem [shape: f32[128,32], index: 10, kind: input, shape index: {}]   ;;  %s3479_s11 = inlined_call_operand.vmem [shape: f32[1,32], index: 11, kind: input, shape index: {}]   ;;  %s3480_s12 = inlined_call_operand.vmem [shape: f32[32,2], index: 12, kind: input, shape index: {}]   ;;  %s3481_s13 = inlined_call_operand.vmem [shape: f32[1,2], index: 13, kind: input, shape index: {}]   ;;  %s3482_s14 = inlined_call_operand.hbm [shape: f32[2,1,2], index: 14, kind: output, shape index: {}]  }
   0x1   :  { %3484 = sst [smem:[#allocation12_spill]] %s3468_s0 }
   0x2   :  { %3485 = sst [smem:[#allocation13_spill]] %s3469_s1 }
   0x3   :  { %3486 = sst [smem:[#allocation14_spill]] %s3470_s2 }
   0x4   :  { %19 = vsyncpa [#allocation8], 0 }
   0x5   :  { %21 = vsyncpa [#allocation8 + $0x1], 0  ;;  %s2885_s29 = smov 0   ;;  %s2887_s30 = smov 0  }
   0x6   :  { %s2889_s15 = smov 0   ;;  %s2891_s16 = smov 0  }
   0x7 LB: > { %3487 = sst [smem:[#allocation10_spill]] %s2795_s15  ;;  %s2906_s17 = sadd.s32 4294967295, %s2799_s16   ;;  %s2799_s16 = sphi %s2891_s16, %s3499_s16   ;;  %s2795_s15 = sphi %s2889_s15, %s3498_s15   ;;  %s2791_s30 = sphi %s2887_s30, %s3497_s30   ;;  %s2787_s29 = sphi %s2885_s29, %s3496_s29  }
   0x8   : > { %s2181_s18 = sadd.s32 4294967294, %s2799_s16   ;;  %s2910_s19 = sadd.s32 1, %s2799_s16  }
   0x9   : > { %s343_s20 = sadd.s32 1, %s2795_s15  ;;  %s340_s21 = ssub.s32 %s2799_s16, %s2910_s19 }
   0xa   : > { %p353_p0 = scmp.ne.s32.totalorder %s2795_s15, %s2791_s30  ;;  %p341_p1 = scmp.eq.s32.totalorder %s340_s21, 0 }
   0xb   : > { %p354_p2 = scmp.eq.s32.totalorder %s2906_s17, 1  ;;  %p359_p3 = scmp.ne.s32.totalorder %s2791_s30, %s2787_s29 }
   0xc   : > { %p360_p4 = scmp.eq.s32.totalorder %s2181_s18, 1  ;;  %p2184_p7 = scmp.ge.s32.totalorder %s2799_s16, 1 }
   0xd   : > { %s2921_s22 = scalar_select %p341_p1, %s2795_s15, %s343_s20  }
   0xe   : > { %p2923_p5 = por %p354_p2, %p353_p0  ;;  %p2927_p6 = por %p360_p4, %p359_p3 }
   0xf   : > { %3488 = sst [smem:[#allocation11_spill]] %s2921_s22  ;;  %p433_p8 = scmp.lt.s32.totalorder %s2799_s16, 3 }
  0x11   : > { %p434_p9 = pnand %p2184_p7, %p433_p8 }
  0x12   : > { %p486_p10 = scmp.lt.s32.totalorder (!%p434_p9), %s2906_s17, 1  ;;  %s3491_s1 = sld [smem:[#allocation13_spill]] (!%p434_p9)  ;;  %v2801_v1 = vmov (!%p434_p9), 0.0   ;;  %vm500_vm0 = vcmask (!%p434_p9), 441344   ;;  %vm2802_vm1 = vmmov (!%p434_p9), 0   ;;  %vm648_vm2 = vcmask (!%p434_p9), 1042432  }
  0x13   : > { %437 = sbr.rel (%p434_p9) target bundleno = 2365 (0x93d), region = 76  ;;  %2385 = vmatprep.subr.bf16.mxu0 (!%p434_p9), %v2801_v1  ;;  %2413 = vmatprep.subr.bf16.mxu1 (!%p434_p9), %v2801_v1  ;;  %503 = vst.msk [vmem:[#allocation2 + $0x10] sm:$0xff] (!%p434_p9), %vm500_vm0, %v2801_v1  ;;  %504 = vst.msk [vmem:[#allocation2 + $0x18] sm:$0xff] (!%p434_p9), %vm500_vm0, %v2801_v1  ;;  %s3492_s0 = sld [smem:[#allocation12_spill]] (!%p434_p9)  ;;  %vm536_vm3 = vcmask (!%p434_p9), 416792   ;;  %vm510_vm13 = vcmask (!%p434_p9), 326656  }
  0x14   : > { %501 = vst.msk [vmem:[#allocation2] sm:$0xff] (!%p434_p9), %vm500_vm0, %v2801_v1  ;;  %502 = vst.msk [vmem:[#allocation2 + $0x8] sm:$0xff] (!%p434_p9), %vm500_vm0, %v2801_v1  ;;  %2393 = vmatprep.mubr.msk.bf16.mxu0 (!%p434_p9), %vm2802_vm1, %v2801_v1  ;;  %s2803_s22 = smov (!%p434_p9), 3   ;;  %2421 = vmatprep.mubr.msk.bf16.mxu1 (!%p434_p9), %vm2802_vm1, %v2801_v1  ;;  %s3493_s2 = sld [smem:[#allocation14_spill]] (!%p434_p9)  ;;  %vm1065_vm14 = vcmask (!%p434_p9), 261120   ;;  %vm1185_vm15 = vcmask (!%p434_p9), 1043456  }
  0x15   : > { %505 = vst.msk [vmem:[#allocation2 + $0x20] sm:$0xff] (!%p434_p9), %vm500_vm0, %v2801_v1  ;;  %506 = vst.msk [vmem:[#allocation2 + $0x28] sm:$0xff] (!%p434_p9), %vm500_vm0, %v2801_v1  ;;  %s2808_s21 = smov (!%p434_p9), 32   ;;  %s484_s26 = sand.u32 (!%p434_p9), 1, %s2791_s30  }
  0x16   : > { %507 = vst.msk [vmem:[#allocation2 + $0x30] sm:$0xff] (!%p434_p9), %vm500_vm0, %v2801_v1  ;;  %508 = vst.msk [vmem:[#allocation2 + $0x38] sm:$0xff] (!%p434_p9), %vm500_vm0, %v2801_v1 }
  0x17   : > { %509 = vst.msk [vmem:[#allocation2 + $0x40] sm:$0xff] (!%p434_p9), %vm500_vm0, %v2801_v1 }
  0x18   : > { %v2707_v0 = vld [vmem:[%s3491_s1 + $0x1c] sm:$0xff] (!%p434_p9)   ;;  %v2709_v3 = vld [vmem:[%s3491_s1 + $0x24] sm:$0xff] (!%p434_p9)   ;;  %v2711_v7 = vld [vmem:[%s3491_s1 + $0x2c] sm:$0xff] (!%p434_p9)   ;;  %511 = vst.msk [vmem:[#allocation3] sm:$0xff] (!%p434_p9), %vm510_vm13, %v2801_v1 }
  0x19   : > { %2386 = vmatpush3.bf16.msra.mxu0 (!%p434_p9), %v2707_v0  ;;  %v2708_v2 = vld [vmem:[%s3491_s1] sm:$0xff] (!%p434_p9)   ;;  %v2710_v4 = vld [vmem:[%s3491_s1 + $0x8] sm:$0xff] (!%p434_p9)   ;;  %v2712_v10 = vld [vmem:[%s3491_s1 + $0x10] sm:$0xff] (!%p434_p9)   ;;  %512 = vst.msk [vmem:[#allocation3 + $0x8] sm:$0xff] (!%p434_p9), %vm510_vm13, %v2801_v1 }
  0x1a   : > { %s2940_s27 = scalar_select %p486_p10, %s2906_s17, 1  ;;  %2387 = vmatprep.subr.bf16.mxu0 %v2801_v1  ;;  %2414 = vmatpush3.bf16.msra.mxu1 %v2708_v2  ;;  %v2713_v12 = vld [vmem:[%s3491_s1 + $0x34] ss:$0 sps:$4 sm:$0x77]   ;;  %v2715_v26 = vld [vmem:[%s3491_s1 + $0x38] sm:$0xff]   ;;  %v2716_v34 = vld [vmem:[%s3491_s1 + $0x40] sm:$0xff]  }
  0x1b   : > { %2415 = vmatprep.subr.bf16.mxu1 %v2801_v1  ;;  %v2714_v13 = vld [vmem:[%s3491_s1 + $0x18] ss:$0 sps:$4 sm:$0x77]   ;;  %v650_v15 = vsel %vm648_vm2, %v2713_v12, 0  ;;  %v2717_v41 = vld [vmem:[%s3491_s1 + $0x48] sm:$0xff]   ;;  %513 = vst.msk [vmem:[#allocation3 + $0x10] sm:$0xff] %vm510_vm13, %v2801_v1 }
  0x1c   : > { %s2293_s25 = sshll.u32 %s2940_s27, 6  ;;  %v761_v16 = vsel %vm648_vm2, %v2714_v13, 0  ;;  %v2718_v42 = vld [vmem:[%s3491_s1 + $0x50] ss:$0 sps:$4 sm:$0x77]   ;;  %514 = vst.msk [vmem:[#allocation3 + $0x18] sm:$0xff] %vm510_vm13, %v2801_v1 }
  0x1d   : > { %s2974_s15 = scalar_lea.vmem %s3492_s0, %s2293_s25  ;;  %2388 = vmatpush3.bf16.msra.mxu0 %v2709_v3  ;;  %v894_v47 = vsel %vm648_vm2, %v2718_v42, 0  ;;  %s2804_s25 = smov 96   ;;  %515 = vst.msk [vmem:[#allocation3 + $0x20] sm:$0xff] %vm510_vm13, %v2801_v1  ;;  %vm1104_vm2 = vcmask 293920  }
  0x1e   : > { %v522_v5 = vld [vmem:[%s2974_s15 + $0x10] sm:$0xff]  ;;  %v520_v6 = vld [vmem:[%s2974_s15] sm:$0xff]  ;;  %v523_v8 = vld [vmem:[%s2974_s15 + $0x18] sm:$0xff]  ;;  %2416 = vmatpush3.bf16.msra.mxu1 %v2710_v4  ;;  %2389 = vmatprep.subr.bf16.mxu0 %v2801_v1 }
  0x1f   : > { %541 = vrot.lane.b32.xlu1 %v522_v5, %s2803_s22  ;;  %530 = vrot.lane.b32.xlu0 %v520_v6, %s2803_s22  ;;  %v521_v9 = vld [vmem:[%s2974_s15 + $0x8] sm:$0xff]  ;;  %v524_v14 = vld [vmem:[%s2974_s15 + $0x20] sm:$0xff] }
  0x20   : > { %2417 = vmatprep.subr.bf16.mxu1 %v2801_v1  ;;  %v525_v11 = vld [vmem:[%s2974_s15 + $0x28] sm:$0xff]  ;;  %v527_v17 = vld [vmem:[%s2974_s15 + $0x38] sm:$0xff]  ;;  %v526_v18 = vld [vmem:[%s2974_s15 + $0x30] sm:$0xff]  ;;  %s2805_s15 = smov 4  }
  0x21   : > { %2390 = vmatpush3.bf16.msra.mxu0 %v2711_v7 }
  0x22   : > { %2418 = vmatpush3.bf16.msra.mxu1 %v2712_v10  ;;  %2391 = vmatprep.subr.bf16.mxu0 %v2801_v1 }
  0x23   : > { %543 = vrot.lane.b32.xlu1 %v523_v8, %s2803_s22  ;;  %532 = vrot.lane.b32.xlu0 %v521_v9, %s2803_s22 }
  0x24   : > { %2419 = vmatprep.subr.bf16.mxu1 %v2801_v1 }
  0x25   : > { %2392 = vmatpush3.bf16.msra.mxu0 %v650_v15 }
  0x26   : > { %2420 = vmatpush3.bf16.msra.mxu1 %v761_v16  ;;  %2441 = vmatprep.subr.bf16.mxu0 %v2801_v1 }
  0x27   : > { %553 = vrot.lane.b32.xlu1 %v525_v11, %s2803_s22  ;;  %551 = vrot.lane.b32.xlu0 %v524_v14, %s2803_s22 }
  0x28   : > { %2469 = vmatprep.subr.bf16.mxu1 %v2801_v1 }
  0x2b   : > { %563 = vrot.lane.b32.xlu1 %v527_v17, %s2803_s22  ;;  %561 = vrot.lane.b32.xlu0 %v526_v18, %s2803_s22  ;;  %s2806_s22 = smov 8  }
  0x91   : > { %v542_v19 = vpop.permute.xlu1 %541  ;;  %v531_v20 = vpop.permute.xlu0 %530 }
  0x92   : > { %547 = vst.msk [vmem:[#allocation2 + $0x13] sm:$0xff] %vm536_vm3, %v542_v19  ;;  %537 = vst.msk [vmem:[#allocation2 + $0x1] sm:$0xff] %vm536_vm3, %v531_v20 }
  0x95   : > { %v544_v21 = vpop.permute.xlu1 %543  ;;  %v533_v22 = vpop.permute.xlu0 %532 }
  0x96   : > { %548 = vst.msk [vmem:[#allocation2 + $0x1b] sm:$0xff] %vm536_vm3, %v544_v21  ;;  %538 = vst.msk [vmem:[#allocation2 + $0x9] sm:$0xff] %vm536_vm3, %v533_v22 }
  0x99   : > { %v554_v23 = vpop.permute.xlu1 %553  ;;  %v552_v24 = vpop.permute.xlu0 %551  ;;  %v590_v25 = vld [vmem:[#allocation2 + $0x1] sm:$0xff]  ;;  %v592_v35 = vld [vmem:[#allocation2 + $0x11] sm:$0xff] }
  0x9a   : > { %558 = vst.msk [vmem:[#allocation2 + $0x2d] sm:$0xff] %vm536_vm3, %v554_v23  ;;  %557 = vst.msk [vmem:[#allocation2 + $0x25] sm:$0xff] %vm536_vm3, %v552_v24  ;;  %v569_v28 = vld [vmem:[#allocation2] sm:$0xff]  ;;  %v837_v63 = vld [vmem:[#allocation2 + $0x12] sm:$0xff] }
  0x9d   : > { %v591_v27 = vld [vmem:[#allocation2 + $0x9] sm:$0xff]  ;;  %v564_v30 = vpop.permute.xlu1 %563  ;;  %v562_v31 = vpop.permute.xlu0 %561  ;;  %v593_v36 = vld [vmem:[#allocation2 + $0x19] sm:$0xff] }
  0x9e   : > { %v570_v29 = vld [vmem:[#allocation2 + $0x8] sm:$0xff]  ;;  %v599_v32 = vpack.c.bf16 %v591_v27, %v590_v25  ;;  %568 = vst.msk [vmem:[#allocation2 + $0x3f] sm:$0xff] %vm536_vm3, %v564_v30  ;;  %567 = vst.msk [vmem:[#allocation2 + $0x37] sm:$0xff] %vm536_vm3, %v562_v31  ;;  %v571_v37 = vld [vmem:[#allocation2 + $0x10] sm:$0xff]  ;;  %v600_v39 = vpack.c.bf16 %v593_v36, %v592_v35  ;;  %vm1114_vm3 = vcmask 293921  }
  0x9f   : > { %v578_v33 = vpack.c.bf16 %v570_v29, %v569_v28  ;;  %v572_v38 = vld [vmem:[#allocation2 + $0x18] sm:$0xff]  ;;  %v835_v60 = vld [vmem:[#allocation2 + $0x2] sm:$0xff]  ;;  %v836_v61 = vld [vmem:[#allocation2 + $0xa] sm:$0xff] }
  0xa0   : > { %2394 = vmatmul.mubr.msk.bf16.vlgmr.msra.gmra.mrb[0].mxu0 %vm500_vm0, %v599_v32  ;;  %v579_v40 = vpack.c.bf16 %v572_v38, %v571_v37  ;;  %v844_v62 = vpack.c.bf16 %v836_v61, %v835_v60  ;;  %v838_v0 = vld [vmem:[#allocation2 + $0x1a] sm:$0xff] }
  0xa1   : > { %2422 = vmatmul.mubr.msk.bf16.vlgmr.msra.gmra.mrb[0].mxu1 %vm500_vm0, %v578_v33  ;;  %2442 = vmatpush3.bf16.msra.mxu0 %v2715_v26  ;;  %v594_v43 = vld [vmem:[#allocation2 + $0x21] sm:$0xff]  ;;  %v595_v44 = vld [vmem:[#allocation2 + $0x29] sm:$0xff]  ;;  %v845_v2 = vpack.c.bf16 %v838_v0, %v837_v63  ;;  %v3096_v61 = vld [vmem:[%s3493_s2] ss:$0 sm:$0xff] }
  0xa2   : > { %2397 = vmatprep.mubr.msk.bf16.mxu0 %vm2802_vm1, %v2801_v1  ;;  %2425 = vmatprep.mubr.msk.bf16.mxu1 %vm2802_vm1, %v2801_v1  ;;  %v573_v45 = vld [vmem:[#allocation2 + $0x20] sm:$0xff]  ;;  %v574_v46 = vld [vmem:[#allocation2 + $0x28] sm:$0xff]  ;;  %v601_v48 = vpack.c.bf16 %v595_v44, %v594_v43 }
  0xa3   : > { %2443 = vmatprep.subr.bf16.mxu0 %v2801_v1  ;;  %v580_v49 = vpack.c.bf16 %v574_v46, %v573_v45  ;;  %v839_v3 = vld [vmem:[#allocation2 + $0x22] sm:$0xff]  ;;  %v840_v4 = vld [vmem:[#allocation2 + $0x2a] sm:$0xff] }
  0xa4   : > { %v846_v5 = vpack.c.bf16 %v840_v4, %v839_v3 }
  0xa5   : > { %2444 = vmatpush3.bf16.msra.mxu0 %v2716_v34  ;;  %v596_v50 = vld [vmem:[#allocation2 + $0x31] sm:$0xff]  ;;  %v597_v51 = vld [vmem:[#allocation2 + $0x39] sm:$0xff]  ;;  %v598_v56 = vld [vmem:[#allocation2 + $0x41] sm:$0x3f] }
  0xa6   : > { %2445 = vmatprep.subr.bf16.mxu0 %v2801_v1  ;;  %v575_v52 = vld [vmem:[#allocation2 + $0x30] sm:$0xff]  ;;  %v576_v53 = vld [vmem:[#allocation2 + $0x38] sm:$0xff]  ;;  %v602_v54 = vpack.c.bf16 %v597_v51, %v596_v50  ;;  %v577_v57 = vld [vmem:[#allocation2 + $0x40] sm:$0x3f]  ;;  %v603_v58 = vpack.c.bf16 %v598_v56, %v598_v56 }
  0xa7   : > { %v581_v55 = vpack.c.bf16 %v576_v53, %v575_v52  ;;  %v582_v59 = vpack.c.bf16 %v577_v57, %v577_v57  ;;  %v841_v6 = vld [vmem:[#allocation2 + $0x32] sm:$0xff]  ;;  %v842_v7 = vld [vmem:[#allocation2 + $0x3a] sm:$0xff]  ;;  %v843_v9 = vld [vmem:[#allocation2 + $0x42] sm:$0x3f] }
  0xa8   : > { %2398 = vmatmul.mubr.msk.bf16.gmra.mrb[4].mxu0 %vm500_vm0, %v600_v39  ;;  %v847_v8 = vpack.c.bf16 %v842_v7, %v841_v6  ;;  %v848_v10 = vpack.c.bf16 %v843_v9, %v843_v9 }
  0xa9   : > { %2426 = vmatmul.mubr.msk.bf16.gmra.mrb[4].mxu1 %vm500_vm0, %v579_v40  ;;  %2401 = vmatprep.mubr.msk.bf16.mxu0 %vm2802_vm1, %v2801_v1 }
  0xaa   : > { %2429 = vmatprep.mubr.msk.bf16.mxu1 %vm2802_vm1, %v2801_v1  ;;  %2446 = vmatpush3.bf16.msra.mxu0 %v2717_v41 }
  0xab   : > { %2447 = vmatprep.subr.bf16.mxu0 %v2801_v1 }
  0xae   : > { %2448 = vmatpush3.bf16.msra.mxu0 %v894_v47 }
  0xaf   : > { %2505 = vmatprep.subr.bf16.mxu0 %v2801_v1 }
  0xb0   : > { %2402 = vmatmul.mubr.msk.bf16.gmra.mrb[8].mxu0 %vm500_vm0, %v601_v48 }
  0xb1   : > { %2430 = vmatmul.mubr.msk.bf16.gmra.mrb[8].mxu1 %vm500_vm0, %v580_v49  ;;  %2405 = vmatprep.mubr.msk.bf16.mxu0 %vm2802_vm1, %v2801_v1 }
  0xb2   : > { %2433 = vmatprep.mubr.msk.bf16.mxu1 %vm2802_vm1, %v2801_v1 }
  0xb8   : > { %2406 = vmatmul.mubr.msk.bf16.gmra.mrb[12].mxu0 %vm500_vm0, %v602_v54 }
  0xb9   : > { %2434 = vmatmul.mubr.msk.bf16.gmra.mrb[12].mxu1 %vm500_vm0, %v581_v55  ;;  %2409 = vmatprep.mubr.msk.bf16.mxu0 %vm2802_vm1, %v2801_v1 }
  0xba   : > { %2437 = vmatprep.mubr.msk.bf16.mxu1 %vm2802_vm1, %v2801_v1 }
  0xc0   : > { %2410 = vmatmul.mubr.msk.bf16.gmra.mrb[16].mxu0 %vm500_vm0, %v603_v58 }
  0xc1   : > { %2438 = vmatmul.mubr.msk.bf16.gmra.mrb[16].mxu1 %vm500_vm0, %v582_v59  ;;  %2449 = vmatprep.mubr.msk.bf16.mxu0 %vm2802_vm1, %v2801_v1 }
  0xc2   : > { %2475 = vmatprep.mubr.msk.bf16.mxu1 %vm2802_vm1, %v2801_v1 }
  0xc8   : > { %2450 = vmatmul.mubr.msk.bf16.vlgmr.msra.gmra.mrb[20].mxu0 %vm500_vm0, %v844_v62 }
  0xc9   : > { %2453 = vmatprep.mubr.msk.bf16.mxu0 %vm2802_vm1, %v2801_v1 }
  0xd0   : > { %2454 = vmatmul.mubr.msk.bf16.gmra.mrb[24].mxu0 %vm500_vm0, %v845_v2 }
  0xd1   : > { %2457 = vmatprep.mubr.msk.bf16.mxu0 %vm2802_vm1, %v2801_v1 }
  0xd8   : > { %2458 = vmatmul.mubr.msk.bf16.gmra.mrb[28].mxu0 %vm500_vm0, %v846_v5 }
  0xd9   : > { %2461 = vmatprep.mubr.msk.bf16.mxu0 %vm2802_vm1, %v2801_v1 }
  0xe0   : > { %2462 = vmatmul.mubr.msk.bf16.gmra.mrb[32].mxu0 %vm500_vm0, %v847_v8 }
  0xe1   : > { %2465 = vmatprep.mubr.msk.bf16.mxu0 %vm2802_vm1, %v2801_v1 }
  0xe8   : > { %2466 = vmatmul.mubr.msk.bf16.gmra.mrb[36].mxu0 %vm500_vm0, %v848_v10  ;;  %vm1074_vm0 = vcmask 259072  }
  0xe9   : > { %2511 = vmatprep.mubr.msk.bf16.mxu0 %vm2802_vm1, %v2801_v1 }
 0x173   : > { %v686_v11 = vpop.f32.mrb[0].mxu0 }
 0x174   : > { %v797_v12 = vpop.f32.mrb[0].mxu1  ;;  %v2395_v14 = vpop.f32.mrb[1].mxu0 }
 0x175   : > { %v798_v13 = vadd.f32 %v797_v12, %v686_v11  ;;  %v2423_v15 = vpop.f32.mrb[1].mxu1  ;;  %v689_v16 = vpop.f32.mrb[2].mxu0 }
 0x176   : > { %v800_v17 = vpop.f32.mrb[2].mxu1  ;;  %v2396_v19 = vpop.f32.mrb[3].mxu0 }
 0x177   : > { %v801_v18 = vadd.f32 %v800_v17, %v689_v16  ;;  %v2424_v20 = vpop.f32.mrb[3].mxu1 }
 0x17b   : > { %v694_v21 = vpop.f32.mrb[4].mxu0 }
 0x17c   : > { %v805_v22 = vpop.f32.mrb[4].mxu1  ;;  %v2399_v24 = vpop.f32.mrb[5].mxu0 }
 0x17d   : > { %v806_v23 = vadd.f32 %v805_v22, %v694_v21  ;;  %v2427_v25 = vpop.f32.mrb[5].mxu1  ;;  %v697_v26 = vpop.f32.mrb[6].mxu0 }
 0x17e   : > { %v808_v27 = vpop.f32.mrb[6].mxu1  ;;  %v2400_v29 = vpop.f32.mrb[7].mxu0 }
 0x17f   : > { %v809_v28 = vadd.f32 %v808_v27, %v697_v26  ;;  %v2428_v30 = vpop.f32.mrb[7].mxu1 }
 0x183   : > { %v702_v31 = vpop.f32.mrb[8].mxu0 }
 0x184   : > { %v813_v32 = vpop.f32.mrb[8].mxu1  ;;  %v2403_v34 = vpop.f32.mrb[9].mxu0 }
 0x185   : > { %v814_v33 = vadd.f32 %v813_v32, %v702_v31  ;;  %v2431_v35 = vpop.f32.mrb[9].mxu1  ;;  %v705_v36 = vpop.f32.mrb[10].mxu0 }
 0x186   : > { %v816_v37 = vpop.f32.mrb[10].mxu1  ;;  %v2404_v39 = vpop.f32.mrb[11].mxu0 }
 0x187   : > { %v817_v38 = vadd.f32 %v816_v37, %v705_v36  ;;  %v2432_v40 = vpop.f32.mrb[11].mxu1 }
 0x18b   : > { %v710_v41 = vpop.f32.mrb[12].mxu0 }
 0x18c   : > { %v821_v42 = vpop.f32.mrb[12].mxu1  ;;  %v2407_v44 = vpop.f32.mrb[13].mxu0 }
 0x18d   : > { %v3087_v43 = vadd.f32 %v821_v42, %v710_v41  ;;  %v2435_v45 = vpop.f32.mrb[13].mxu1  ;;  %v713_v46 = vpop.f32.mrb[14].mxu0 }
 0x18e   : > { %v824_v47 = vpop.f32.mrb[14].mxu1  ;;  %v2408_v49 = vpop.f32.mrb[15].mxu0 }
 0x18f   : > { %v3089_v48 = vadd.f32 %v824_v47, %v713_v46  ;;  %v2436_v50 = vpop.f32.mrb[15].mxu1 }
 0x193   : > { %v718_v51 = vpop.f32.mrb[16].mxu0 }
 0x194   : > { %v829_v52 = vpop.f32.mrb[16].mxu1  ;;  %v2411_v54 = vpop.f32.mrb[17].mxu0 }
 0x195   : > { %v3091_v53 = vadd.f32 %v829_v52, %v718_v51  ;;  %v2439_v55 = vpop.f32.mrb[17].mxu1  ;;  %v721_v56 = vpop.f32.mrb[18].mxu0 }
 0x196   : > { %v832_v57 = vpop.f32.mrb[18].mxu1  ;;  %v2412_v58 = vpop.f32.mrb[19].mxu0  ;;  %v2719_v55 = vld [vmem:[%s3471_s3 + $0x14] sm:$0xff]  }
 0x197   : > { %v2440_v59 = vpop.f32.mrb[19].mxu1  ;;  %2470 = vmatpush3.bf16.msra.mxu1 %v2719_v55  ;;  %v2720_v58 = vld [vmem:[%s3471_s3 + $0x1c] sm:$0xff]  }
 0x198   : > { %2471 = vmatprep.subr.bf16.mxu1 %v2801_v1  ;;  %v2721_v59 = vld [vmem:[%s3471_s3 + $0x28] sm:$0xff]  }
 0x199   : > { %2506 = vmatpush3.bf16.msra.mxu0 %v2721_v59 }
 0x19a   : > { %2507 = vmatprep.subr.bf16.mxu0 %v2801_v1 }
 0x19b   : > { %v930_v60 = vpop.f32.mrb[20].mxu0  ;;  %2472 = vmatpush3.bf16.msra.mxu1 %v2720_v58 }
 0x19c   : > { %v968_v62 = vadd.f32 %v930_v60, %v798_v13  ;;  %v2451_v63 = vpop.f32.mrb[21].mxu0  ;;  %2473 = vmatprep.subr.bf16.mxu1 %v2801_v1 }
 0x19d   : > { %v933_v0 = vpop.f32.mrb[22].mxu0 }
 0x19e   : > { %v984_v2 = vadd.f32 %v3096_v61, %v968_v62  ;;  %v969_v3 = vadd.f32 %v933_v0, %v801_v18  ;;  %v2452_v4 = vpop.f32.mrb[23].mxu0  ;;  %v2722_v0 = vld [vmem:[%s3471_s3 + $0x30] sm:$0xff]  }
 0x19f   : > { %2508 = vmatpush3.bf16.msra.mxu0 %v2722_v0 }
 0x1a0   : > { %v985_v5 = vadd.f32 %v3096_v61, %v969_v3  ;;  %vm993_vm4 = vcmp.gt.f32.partialorder %v984_v2, 0.0  ;;  %v1002_v6 = vmul.f32 0.01, %v984_v2  ;;  %v2724_v3 = vld [vmem:[%s3471_s3 + $0x38] ss:$0 sps:$4 sm:$0xff]   ;;  %2509 = vmatprep.subr.bf16.mxu0 %v2801_v1 }
 0x1a2   : > { %v3100_v7 = vsel %vm993_vm4, %v984_v2, %v1002_v6  ;;  %vm994_vm5 = vcmp.gt.f32.partialorder %v985_v5, 0.0  ;;  %v1003_v8 = vmul.f32 0.01, %v985_v5  ;;  %v2723_v2 = vld [vmem:[%s3471_s3 + $0x24] ss:$0 sps:$4 sm:$0xff]   ;;  %vm1116_vm4 = vcmask 286752  }
 0x1a3   : > { %1029 = vrot.lane.b32.xlu0 %v3100_v7, %s2804_s25  ;;  %v938_v9 = vpop.f32.mrb[24].mxu0 }
 0x1a4   : > { %v970_v10 = vadd.f32 %v938_v9, %v806_v23  ;;  %v2455_v11 = vpop.f32.mrb[25].mxu0  ;;  %v3104_v12 = vsel %vm994_vm5, %v985_v5, %v1003_v8  ;;  %v1367_v9 = vsel %vm1185_vm15, %v2724_v3, 0  ;;  %vm1122_vm5 = vcmask 293922  }
 0x1a5   : > { %1031 = vrot.lane.b32.xlu1 %v3104_v12, %s2804_s25  ;;  %v941_v13 = vpop.f32.mrb[26].mxu0  ;;  %2510 = vmatpush3.bf16.msra.mxu0 %v1367_v9 }
 0x1a6   : > { %v986_v14 = vadd.f32 %v3096_v61, %v970_v10  ;;  %v971_v15 = vadd.f32 %v941_v13, %v809_v28  ;;  %v2456_v16 = vpop.f32.mrb[27].mxu0 }
 0x1a8   : > { %v987_v17 = vadd.f32 %v3096_v61, %v971_v15  ;;  %vm995_vm6 = vcmp.gt.f32.partialorder %v986_v14, 0.0  ;;  %v1004_v18 = vmul.f32 0.01, %v986_v14 }
 0x1aa   : > { %v3110_v19 = vsel %vm995_vm6, %v986_v14, %v1004_v18  ;;  %vm996_vm7 = vcmp.gt.f32.partialorder %v987_v17, 0.0  ;;  %v1005_v20 = vmul.f32 0.01, %v987_v17  ;;  %vm1124_vm6 = vcmask 287776  }
 0x1ab   : > { %1033 = vrot.lane.b32.xlu0 %v3110_v19, %s2804_s25  ;;  %v946_v21 = vpop.f32.mrb[28].mxu0 }
 0x1ac   : > { %v972_v22 = vadd.f32 %v946_v21, %v814_v33  ;;  %v2459_v23 = vpop.f32.mrb[29].mxu0  ;;  %v3114_v24 = vsel %vm996_vm7, %v987_v17, %v1005_v20  ;;  %vm1130_vm7 = vcmask 293923  }
 0x1ad   : > { %1035 = vrot.lane.b32.xlu1 %v3114_v24, %s2804_s25  ;;  %v949_v25 = vpop.f32.mrb[30].mxu0 }
 0x1ae   : > { %v988_v26 = vadd.f32 %v3096_v61, %v972_v22  ;;  %v973_v27 = vadd.f32 %v949_v25, %v817_v38  ;;  %v2460_v28 = vpop.f32.mrb[31].mxu0 }
 0x1b0   : > { %v989_v29 = vadd.f32 %v3096_v61, %v973_v27  ;;  %vm997_vm8 = vcmp.gt.f32.partialorder %v988_v26, 0.0  ;;  %v1006_v30 = vmul.f32 0.01, %v988_v26 }
 0x1b2   : > { %v3120_v31 = vsel %vm997_vm8, %v988_v26, %v1006_v30  ;;  %vm998_vm9 = vcmp.gt.f32.partialorder %v989_v29, 0.0  ;;  %v1007_v32 = vmul.f32 0.01, %v989_v29  ;;  %vm1132_vm8 = vcmask 288800  }
 0x1b3   : > { %1037 = vrot.lane.b32.xlu0 %v3120_v31, %s2804_s25  ;;  %v954_v33 = vpop.f32.mrb[32].mxu0 }
 0x1b4   : > { %v974_v34 = vadd.f32 %v954_v33, %v3087_v43  ;;  %v2463_v35 = vpop.f32.mrb[33].mxu0  ;;  %v3125_v36 = vsel %vm998_vm9, %v989_v29, %v1007_v32 }
 0x1b5   : > { %1039 = vrot.lane.b32.xlu1 %v3125_v36, %s2804_s25  ;;  %v957_v37 = vpop.f32.mrb[34].mxu0  ;;  %v2725_v35 = vld [vmem:[%s3471_s3] sm:$0xff]  }
 0x1b6   : > { %v990_v38 = vadd.f32 %v3096_v61, %v974_v34  ;;  %v975_v39 = vadd.f32 %v957_v37, %v3089_v48  ;;  %v2464_v40 = vpop.f32.mrb[35].mxu0 }
 0x1b8   : > { %v991_v41 = vadd.f32 %v3096_v61, %v975_v39  ;;  %vm999_vm10 = vcmp.gt.f32.partialorder %v990_v38, 0.0  ;;  %v1008_v42 = vmul.f32 0.01, %v990_v38 }
 0x1ba   : > { %v3132_v44 = vsel %vm999_vm10, %v990_v38, %v1008_v42  ;;  %vm1000_vm11 = vcmp.gt.f32.partialorder %v991_v41, 0.0  ;;  %v1009_v43 = vmul.f32 0.01, %v991_v41  ;;  %v2726_v42 = vld [vmem:[%s3471_s3 + $0x8] sm:$0xff]  }
 0x1bb   : > { %v962_v45 = vpop.f32.mrb[36].mxu0  ;;  %1041 = vrot.lane.b32.xlu0 %v3132_v44, %s2804_s25 }
 0x1bc   : > { %v976_v46 = vadd.f32 %v962_v45, %v3091_v53  ;;  %v2467_v47 = vpop.f32.mrb[37].mxu0  ;;  %v3137_v49 = vsel %vm1000_vm11, %v991_v41, %v1009_v43 }
 0x1bd   : > { %v965_v50 = vpop.f32.mrb[38].mxu0  ;;  %1043 = vrot.lane.b32.xlu1 %v3137_v49, %s2804_s25 }
 0x1be   : > { %v992_v48 = vadd.f32 %v3096_v61, %v976_v46  ;;  %v2468_v51 = vpop.f32.mrb[39].mxu0 }
 0x1c0   : > { %vm1001_vm12 = vcmp.gt.f32.partialorder %v992_v48, 0.0  ;;  %v1010_v52 = vmul.f32 0.01, %v992_v48 }
 0x1c2   : > { %v3142_v54 = vsel %vm1001_vm12, %v992_v48, %v1010_v52 }
 0x1c3   : > { %1045 = vrot.lane.b32.xlu0 %v3142_v54, %s2804_s25 }
 0x215   : > { %v1030_v53 = vpop.permute.xlu0 %1029 }
 0x216   : > { %v1056_v56 = vmax.f32 %v3100_v7, %v1030_v53  ;;  %v1187_v7 = vsel %vm1185_vm15, %v2723_v2, 0 }
 0x217   : > { %v1032_v57 = vpop.permute.xlu1 %1031  ;;  %2474 = vmatpush3.bf16.msra.mxu1 %v1187_v7 }
 0x218   : > { %1066 = vst.msk [vmem:[#allocation5] sm:$0xff] %vm1065_vm14, %v1056_v56  ;;  %v1057_v60 = vmax.f32 %v3104_v12, %v1032_v57  ;;  %2487 = vmatprep.subr.bf16.mxu1 %v2801_v1 }
 0x21a   : > { %1067 = vst.msk [vmem:[#allocation5 + $0x8] sm:$0xff] %vm1065_vm14, %v1057_v60 }
 0x21d   : > { %v1034_v61 = vpop.permute.xlu0 %1033 }
 0x21e   : > { %v1058_v62 = vmax.f32 %v3110_v19, %v1034_v61 }
 0x21f   : > { %v1036_v63 = vpop.permute.xlu1 %1035 }
 0x220   : > { %1068 = vst.msk [vmem:[#allocation5 + $0x10] sm:$0xff] %vm1065_vm14, %v1058_v62  ;;  %v1059_v4 = vmax.f32 %v3114_v24, %v1036_v63 }
 0x221   : > { %v1076_v5 = vld [vmem:[#allocation5] ss:$2 sm:$0xff]  ;;  %v1086_v6 = vld [vmem:[#allocation5 + $0x1] ss:$2 sm:$0xff] }
 0x222   : > { %1069 = vst.msk [vmem:[#allocation5 + $0x18] sm:$0xff] %vm1065_vm14, %v1059_v4  ;;  %v1095_v8 = vmax.f32 %v1076_v5, %v1086_v6 }
 0x224   : > { %1101 = vrot.lane.b32.xlu1 %v1095_v8, %s2805_s15 }
 0x225   : > { %v1038_v10 = vpop.permute.xlu0 %1037 }
 0x226   : > { %v1060_v11 = vmax.f32 %v3120_v31, %v1038_v10 }
 0x227   : > { %v1040_v12 = vpop.permute.xlu1 %1039 }
 0x228   : > { %1070 = vst.msk [vmem:[#allocation5 + $0x20] sm:$0xff] %vm1065_vm14, %v1060_v11  ;;  %v1061_v13 = vmax.f32 %v3125_v36, %v1040_v12 }
 0x229   : > { %v1078_v14 = vld [vmem:[#allocation5 + $0x10] ss:$2 sm:$0xff]  ;;  %v1088_v15 = vld [vmem:[#allocation5 + $0x11] ss:$2 sm:$0xff] }
 0x22a   : > { %1071 = vst.msk [vmem:[#allocation5 + $0x28] sm:$0xff] %vm1065_vm14, %v1061_v13  ;;  %v1096_v16 = vmax.f32 %v1078_v14, %v1088_v15 }
 0x22c   : > { %1108 = vrot.lane.b32.xlu0 %v1096_v16, %s2805_s15 }
 0x22d   : > { %v1042_v17 = vpop.permute.xlu0 %1041 }
 0x22e   : > { %v1062_v18 = vmax.f32 %v3132_v44, %v1042_v17  ;;  %v2727_v44 = vld [vmem:[%s3471_s3 + $0x10] ss:$0 sps:$4 sm:$0xff]  }
 0x22f   : > { %v1044_v19 = vpop.permute.xlu1 %1043  ;;  %v1270_v45 = vsel %vm1185_vm15, %v2727_v44, 0 }
 0x230   : > { %1072 = vst.msk [vmem:[#allocation5 + $0x30] sm:$0xff] %vm1065_vm14, %v1062_v18  ;;  %v1063_v20 = vmax.f32 %v3137_v49, %v1044_v19 }
 0x231   : > { %v1080_v21 = vld [vmem:[#allocation5 + $0x20] ss:$2 sm:$0xff]  ;;  %v1090_v22 = vld [vmem:[#allocation5 + $0x21] ss:$2 sm:$0xff] }
 0x232   : > { %1073 = vst.msk [vmem:[#allocation5 + $0x38] sm:$0xff] %vm1065_vm14, %v1063_v20  ;;  %v1097_v23 = vmax.f32 %v1080_v21, %v1090_v22 }
 0x234   : > { %1110 = vrot.lane.b32.xlu1 %v1097_v23, %s2805_s15 }
 0x235   : > { %v1046_v24 = vpop.permute.xlu0 %1045 }
 0x236   : > { %v1064_v25 = vmax.f32 %v3142_v54, %v1046_v24 }
 0x238   : > { %1075 = vst.msk [vmem:[#allocation5 + $0x40] sm:$0x3f] %vm1074_vm0, %v1064_v25 }
 0x239   : > { %v1082_v26 = vld [vmem:[#allocation5 + $0x30] ss:$2 sm:$0xff]  ;;  %v1092_v27 = vld [vmem:[#allocation5 + $0x31] ss:$2 sm:$0xff] }
 0x23a   : > { %v1098_v28 = vmax.f32 %v1082_v26, %v1092_v27 }
 0x23c   : > { %1119 = vrot.lane.b32.xlu0 %v1098_v28, %s2805_s15 }
 0x23f   : > { %v1084_v29 = vld [vmem:[#allocation5 + $0x40] ss:$2 sm:$0x7]  ;;  %v1094_v30 = vld [vmem:[#allocation5 + $0x41] ss:$2 sm:$0x7] }
 0x240   : > { %v1099_v31 = vmax.f32 %v1084_v29, %v1094_v30  ;;  %v2259_v29 = vld [vmem:[%s3472_s4] ss:$0 sm:$0xff] }
 0x242   : > { %1127 = vrot.lane.b32.xlu1 %v1099_v31, %s2805_s15 }
 0x296   : > { %v1102_v32 = vpop.permute.xlu1 %1101 }
 0x297   : > { %1105 = vst.msk [vmem:[#allocation3 + $0x1] sm:$0xff] %vm1104_vm2, %v1102_v32  ;;  %vm516_vm2 = vcmask 392192  }
 0x298   : > { %517 = vst.msk [vmem:[#allocation4] sm:$0xff] %vm516_vm2, %v2801_v1  ;;  %518 = vst.msk [vmem:[#allocation4 + $0x8] sm:$0xff] %vm516_vm2, %v2801_v1 }
 0x299   : > { %519 = vst.msk [vmem:[#allocation4 + $0x10] sm:$0xff] %vm516_vm2, %v2801_v1 }
 0x29e   : > { %v1109_v33 = vpop.permute.xlu0 %1108  ;;  %v1147_v34 = vld [vmem:[#allocation3 + $0x1] sm:$0xff] }
 0x29f   : > { %1115 = vst.msk [vmem:[#allocation3 + $0xa] sm:$0xfe] %vm1114_vm3, %v1109_v33  ;;  %v1328_v38 = vld [vmem:[#allocation3 + $0x2] sm:$0xff]  ;;  %vm1500_vm3 = vcmask 322624  }
 0x2a0   : > { %v1134_v58 = vld [vmem:[#allocation3] sm:$0xff] }
 0x2a6   : > { %v1111_v36 = vpop.permute.xlu1 %1110  ;;  %v1148_v37 = vld [vmem:[#allocation3 + $0x9] sm:$0xff] }
 0x2a7   : > { %v1329_v39 = vld [vmem:[#allocation3 + $0xa] sm:$0xff]  ;;  %1117 = vst.msk [vmem:[#allocation3 + $0x12] sm:$0x1] %vm1116_vm4, %v1111_v36  ;;  %v1152_v40 = vpack.c.bf16 %v1148_v37, %v1147_v34  ;;  %vm1506_vm4 = vcmask 326725  }
 0x2a8   : > { %1123 = vst.msk [vmem:[#allocation3 + $0x13] sm:$0xfc] %vm1122_vm5, %v1111_v36  ;;  %v1333_v41 = vpack.c.bf16 %v1329_v39, %v1328_v38  ;;  %v1135_v57 = vld [vmem:[#allocation3 + $0x8] sm:$0xff]  ;;  %vm1508_vm5 = vcmask 319552  }
 0x2a9   : > { %2476 = vmatmul.mubr.msk.bf16.vlgmr.msra.gmra.mrb[20].mxu1 %vm510_vm13, %v1152_v40  ;;  %v1139_v59 = vpack.c.bf16 %v1135_v57, %v1134_v58 }
 0x2aa   : > { %2512 = vmatmul.mubr.msk.bf16.vlgmr.msra.gmra.mrb[40].mxu0 %vm510_vm13, %v1333_v41  ;;  %2488 = vmatpush3.bf16.msra.mxu1 %v2725_v35 }
 0x2ab   : > { %2479 = vmatprep.mubr.msk.bf16.mxu1 %vm2802_vm1, %v2801_v1  ;;  %2489 = vmatprep.subr.bf16.mxu1 %v2801_v1 }
 0x2ac   : > { %2515 = vmatprep.mubr.msk.bf16.mxu0 %vm2802_vm1, %v2801_v1 }
 0x2ae   : > { %v1120_v43 = vpop.permute.xlu0 %1119  ;;  %2490 = vmatpush3.bf16.msra.mxu1 %v2726_v42 }
 0x2af   : > { %1125 = vst.msk [vmem:[#allocation3 + $0x1b] sm:$0x3] %vm1124_vm6, %v1120_v43  ;;  %2491 = vmatprep.subr.bf16.mxu1 %v2801_v1  ;;  %v1149_v47 = vld [vmem:[#allocation3 + $0x11] sm:$0xff]  ;;  %vm1510_vm6 = vcmask 324674  }
 0x2b0   : > { %1131 = vst.msk [vmem:[#allocation3 + $0x1c] sm:$0xf8] %vm1130_vm7, %v1120_v43  ;;  %v1330_v50 = vld [vmem:[#allocation3 + $0x12] sm:$0xff]  ;;  %vm1516_vm7 = vcmask 326727  }
 0x2b1   : > { %v1136_v61 = vld [vmem:[#allocation3 + $0x10] sm:$0xff] }
 0x2b2   : > { %2492 = vmatpush3.bf16.msra.mxu1 %v1270_v45 }
 0x2b4   : > { %v1128_v46 = vpop.permute.xlu1 %1127 }
 0x2b5   : > { %1133 = vst.msk [vmem:[#allocation3 + $0x24] sm:$0x7] %vm1132_vm8, %v1128_v46  ;;  %vm1518_vm8 = vcmask 321600  }
 0x2b7   : > { %v1150_v49 = vld [vmem:[#allocation3 + $0x19] sm:$0xff] }
 0x2b8   : > { %v1331_v48 = vld [vmem:[#allocation3 + $0x1a] sm:$0xff]  ;;  %v1153_v51 = vpack.c.bf16 %v1150_v49, %v1149_v47 }
 0x2b9   : > { %v1334_v52 = vpack.c.bf16 %v1331_v48, %v1330_v50  ;;  %v1137_v60 = vld [vmem:[#allocation3 + $0x18] sm:$0xff] }
 0x2ba   : > { %2480 = vmatmul.mubr.msk.bf16.gmra.mrb[24].mxu1 %vm510_vm13, %v1153_v51  ;;  %v1140_v62 = vpack.c.bf16 %v1137_v60, %v1136_v61 }
 0x2bb   : > { %2516 = vmatmul.mubr.msk.bf16.gmra.mrb[44].mxu0 %vm510_vm13, %v1334_v52  ;;  %2483 = vmatprep.mubr.msk.bf16.mxu1 %vm2802_vm1, %v2801_v1 }
 0x2bc   : > { %2519 = vmatprep.mubr.msk.bf16.mxu0 %vm2802_vm1, %v2801_v1  ;;  %v1151_v54 = vld [vmem:[#allocation3 + $0x21] sm:$0x3f] }
 0x2bd   : > { %v1332_v55 = vld [vmem:[#allocation3 + $0x22] sm:$0x3f]  ;;  %v1154_v53 = vpack.c.bf16 %v1151_v54, %v1151_v54 }
 0x2be   : > { %v1335_v56 = vpack.c.bf16 %v1332_v55, %v1332_v55  ;;  %v1138_v63 = vld [vmem:[#allocation3 + $0x20] sm:$0x3f] }
 0x2bf   : > { %v1141_v0 = vpack.c.bf16 %v1138_v63, %v1138_v63 }
 0x2c2   : > { %2484 = vmatmul.mubr.msk.bf16.gmra.mrb[28].mxu1 %vm510_vm13, %v1154_v53 }
 0x2c3   : > { %2520 = vmatmul.mubr.msk.bf16.gmra.mrb[48].mxu0 %vm510_vm13, %v1335_v56  ;;  %2493 = vmatprep.mubr.msk.bf16.mxu1 %vm2802_vm1, %v2801_v1 }
 0x2ca   : > { %2494 = vmatmul.mubr.msk.bf16.vlgmr.msra.gmra.mrb[32].mxu1 %vm510_vm13, %v1139_v59 }
 0x2cb   : > { %2497 = vmatprep.mubr.msk.bf16.mxu1 %vm2802_vm1, %v2801_v1 }
 0x2d2   : > { %2498 = vmatmul.mubr.msk.bf16.gmra.mrb[36].mxu1 %vm510_vm13, %v1140_v62 }
 0x2d3   : > { %2501 = vmatprep.mubr.msk.bf16.mxu1 %vm2802_vm1, %v2801_v1 }
 0x2da   : > { %2502 = vmatmul.mubr.msk.bf16.gmra.mrb[40].mxu1 %vm510_vm13, %v1141_v0  ;;  %v2728_v0 = vld [vmem:[%s3473_s5 + $0x18] sm:$0xff]  }
 0x2db   : > { %2523 = vmatprep.subr.bf16.mxu1 %v2728_v0 }
 0x2dc   : > { %2524 = vmatpush3.bf16.msra.mxu1 %v2728_v0 }
 0x37c   : > { %v1223_v2 = vpop.f32.mrb[20].mxu1 }
 0x37d   : > { %v1403_v3 = vpop.f32.mrb[40].mxu0  ;;  %v2477_v4 = vpop.f32.mrb[21].mxu1 }
 0x37e   : > { %v2513_v5 = vpop.f32.mrb[41].mxu0  ;;  %v1226_v6 = vpop.f32.mrb[22].mxu1 }
 0x37f   : > { %v1406_v7 = vpop.f32.mrb[42].mxu0  ;;  %v2478_v8 = vpop.f32.mrb[23].mxu1  ;;  %v2729_v5 = vld [vmem:[%s3473_s5 + $0x20] sm:$0xff]  }
 0x380   : > { %v2514_v9 = vpop.f32.mrb[43].mxu0  ;;  %2525 = vmatprep.subr.bf16.mxu1 %v2729_v5 }
 0x381   : > { %2526 = vmatpush3.bf16.msra.mxu1 %v2729_v5 }
 0x38d   : > { %v1231_v10 = vpop.f32.mrb[24].mxu1 }
 0x38e   : > { %v1411_v11 = vpop.f32.mrb[44].mxu0  ;;  %v2481_v12 = vpop.f32.mrb[25].mxu1 }
 0x38f   : > { %v2517_v13 = vpop.f32.mrb[45].mxu0  ;;  %v1234_v14 = vpop.f32.mrb[26].mxu1 }
 0x390   : > { %v1414_v15 = vpop.f32.mrb[46].mxu0  ;;  %v2482_v16 = vpop.f32.mrb[27].mxu1 }
 0x391   : > { %v2518_v17 = vpop.f32.mrb[47].mxu0  ;;  %v2731_v16 = vld [vmem:[%s3473_s5 + $0x28] sm:$0xff]  }
 0x392   : > { %v2732_v17 = vld [vmem:[%s3473_s5 + $0x38] sm:$0xff]   ;;  %2527 = vmatprep.subr.bf16.mxu1 %v2731_v16 }
 0x393   : > { %2528 = vmatpush3.bf16.msra.mxu1 %v2731_v16 }
 0x395   : > { %v1239_v18 = vpop.f32.mrb[28].mxu1 }
 0x396   : > { %v1419_v19 = vpop.f32.mrb[48].mxu0  ;;  %v2485_v20 = vpop.f32.mrb[29].mxu1 }
 0x397   : > { %v2521_v21 = vpop.f32.mrb[49].mxu0  ;;  %v1242_v22 = vpop.f32.mrb[30].mxu1 }
 0x398   : > { %v1422_v23 = vpop.f32.mrb[50].mxu0  ;;  %v2486_v24 = vpop.f32.mrb[31].mxu1  ;;  %v2733_v21 = vld [vmem:[%s3473_s5 + $0x40] sm:$0xff]  }
 0x399   : > { %v2522_v25 = vpop.f32.mrb[51].mxu0  ;;  %v2734_v23 = vld [vmem:[%s3473_s5] sm:$0xff]  }
 0x39a   : > { %2533 = vmatprep.subr.bf16.mxu1 %v2734_v23 }
 0x39d   : > { %v1306_v26 = vpop.f32.mrb[32].mxu1 }
 0x39e   : > { %v1307_v27 = vadd.f32 %v1306_v26, %v1223_v2  ;;  %v2495_v28 = vpop.f32.mrb[33].mxu1 }
 0x39f   : > { %v1309_v30 = vpop.f32.mrb[34].mxu1 }
 0x3a0   : > { %v1425_v31 = vadd.f32 %v1403_v3, %v1307_v27  ;;  %v1310_v32 = vadd.f32 %v1309_v30, %v1226_v6  ;;  %v2496_v33 = vpop.f32.mrb[35].mxu1 }
 0x3a2   : > { %v1437_v34 = vadd.f32 %v2259_v29, %v1425_v31  ;;  %v1426_v35 = vadd.f32 %v1406_v7, %v1310_v32 }
 0x3a4   : > { %v1438_v36 = vadd.f32 %v2259_v29, %v1426_v35  ;;  %vm1442_vm9 = vcmp.gt.f32.partialorder %v1437_v34, 0.0  ;;  %v1447_v37 = vmul.f32 0.01, %v1437_v34 }
 0x3a5   : > { %v1314_v38 = vpop.f32.mrb[36].mxu1 }
 0x3a6   : > { %v1315_v39 = vadd.f32 %v1314_v38, %v1231_v10  ;;  %v2499_v40 = vpop.f32.mrb[37].mxu1  ;;  %v1452_v41 = vsel %vm1442_vm9, %v1437_v34, %v1447_v37  ;;  %vm1443_vm10 = vcmp.gt.f32.partialorder %v1438_v36, 0.0  ;;  %v1448_v42 = vmul.f32 0.01, %v1438_v36  ;;  %v2730_v10 = vld [vmem:[%s3473_s5 + $0x30] sm:$0xff]  }
 0x3a7   : > { %1462 = vrot.lane.b32.xlu0 %v1452_v41, %s2804_s25  ;;  %v1317_v44 = vpop.f32.mrb[38].mxu1  ;;  %2543 = vmatprep.subr.bf16.mxu0 %v2730_v10 }
 0x3a8   : > { %v1427_v43 = vadd.f32 %v1411_v11, %v1315_v39  ;;  %v1318_v45 = vadd.f32 %v1317_v44, %v1234_v14  ;;  %v2500_v46 = vpop.f32.mrb[39].mxu1  ;;  %v1453_v47 = vsel %vm1443_vm10, %v1438_v36, %v1448_v42  ;;  %2544 = vmatpush3.bf16.msra.mxu0 %v2730_v10  ;;  %v2735_v42 = vld [vmem:[%s3473_s5 + $0x8] sm:$0xff]  }
 0x3a9   : > { %1464 = vrot.lane.b32.xlu1 %v1453_v47, %s2804_s25  ;;  %2545 = vmatprep.subr.bf16.mxu0 %v2732_v17 }
 0x3aa   : > { %v1439_v49 = vadd.f32 %v2259_v29, %v1427_v43  ;;  %v1428_v50 = vadd.f32 %v1414_v15, %v1318_v45  ;;  %v2736_v43 = vld [vmem:[%s3473_s5 + $0x10] sm:$0xff]  }
 0x3ac   : > { %v1440_v48 = vadd.f32 %v2259_v29, %v1428_v50  ;;  %vm1444_vm11 = vcmp.gt.f32.partialorder %v1439_v49, 0.0  ;;  %v1449_v51 = vmul.f32 0.01, %v1439_v49  ;;  %2546 = vmatpush3.bf16.msra.mxu0 %v2732_v17  ;;  %v1831_v17 = vld [vmem:[%s3475_s7 + $0x18] sm:$0xff] }
 0x3ad   : > { %v1322_v52 = vpop.f32.mrb[40].mxu1  ;;  %2547 = vmatprep.subr.bf16.mxu0 %v2733_v21 }
 0x3ae   : > { %v1323_v54 = vadd.f32 %v1322_v52, %v1239_v18  ;;  %v2503_v55 = vpop.f32.mrb[41].mxu1  ;;  %v1454_v53 = vsel %vm1444_vm11, %v1439_v49, %v1449_v51  ;;  %vm1445_vm12 = vcmp.gt.f32.partialorder %v1440_v48, 0.0  ;;  %v1450_v56 = vmul.f32 0.01, %v1440_v48 }
 0x3af   : > { %1466 = vrot.lane.b32.xlu0 %v1454_v53, %s2804_s25  ;;  %v1325_v57 = vpop.f32.mrb[42].mxu1 }
 0x3b0   : > { %v1429_v58 = vadd.f32 %v1419_v19, %v1323_v54  ;;  %v2504_v59 = vpop.f32.mrb[43].mxu1  ;;  %v1455_v60 = vsel %vm1445_vm12, %v1440_v48, %v1450_v56  ;;  %2548 = vmatpush3.bf16.msra.mxu0 %v2733_v21  ;;  %vm1818_vm12 = vcmask 256000  }
 0x3b1   : > { %1468 = vrot.lane.b32.xlu1 %v1455_v60, %s2804_s25 }
 0x3b2   : > { %v1441_v61 = vadd.f32 %v2259_v29, %v1429_v58 }
 0x3b4   : > { %vm1446_vm13 = vcmp.gt.f32.partialorder %v1441_v61, 0.0  ;;  %v1451_v62 = vmul.f32 0.01, %v1441_v61 }
 0x3b6   : > { %v1456_v63 = vsel %vm1446_vm13, %v1441_v61, %v1451_v62  ;;  %v2287_v61 = vld [vmem:[%s3474_s6] ss:$0 sm:$0xff] }
 0x3b7   : > { %1470 = vrot.lane.b32.xlu0 %v1456_v63, %s2804_s25 }
 0x419   : > { %v1463_v2 = vpop.permute.xlu0 %1462 }
 0x41a   : > { %v1477_v3 = vmax.f32 %v1452_v41, %v1463_v2 }
 0x41b   : > { %v1465_v4 = vpop.permute.xlu1 %1464 }
 0x41c   : > { %1482 = vst.msk [vmem:[#allocation5] sm:$0xff] %vm1065_vm14, %v1477_v3  ;;  %v1478_v6 = vmax.f32 %v1453_v47, %v1465_v4 }
 0x41e   : > { %1483 = vst.msk [vmem:[#allocation5 + $0x8] sm:$0xff] %vm1065_vm14, %v1478_v6 }
 0x421   : > { %v1467_v7 = vpop.permute.xlu0 %1466 }
 0x422   : > { %v1479_v8 = vmax.f32 %v1454_v53, %v1467_v7 }
 0x423   : > { %v1469_v9 = vpop.permute.xlu1 %1468 }
 0x424   : > { %1484 = vst.msk [vmem:[#allocation5 + $0x10] sm:$0xff] %vm1065_vm14, %v1479_v8  ;;  %v1480_v11 = vmax.f32 %v1455_v60, %v1469_v9 }
 0x425   : > { %v1487_v12 = vld [vmem:[#allocation5] ss:$2 sm:$0xff]  ;;  %v1490_v13 = vld [vmem:[#allocation5 + $0x1] ss:$2 sm:$0xff] }
 0x426   : > { %1485 = vst.msk [vmem:[#allocation5 + $0x18] sm:$0xff] %vm1065_vm14, %v1480_v11  ;;  %v1493_v14 = vmax.f32 %v1487_v12, %v1490_v13  ;;  %v1828_v12 = vld [vmem:[%s3475_s7] sm:$0xff]  ;;  %v1829_v13 = vld [vmem:[%s3475_s7 + $0x8] sm:$0xff] }
 0x427   : > { %v2619_v16 = vpack.c.bf16 %v1829_v13, %v1828_v12 }
 0x428   : > { %1497 = vrot.lane.b32.xlu1 %v1493_v14, %s2806_s22  ;;  %v1830_v14 = vld [vmem:[%s3475_s7 + $0x10] sm:$0xff] }
 0x429   : > { %v1471_v15 = vpop.permute.xlu0 %1470 }
 0x42a   : > { %v1481_v18 = vmax.f32 %v1456_v63, %v1471_v15  ;;  %v2807_v15 = vmov 0.0|0.0  }
 0x42b   : > { %2630 = vmatprep.subr.bf16.mxu0 %v2807_v15 }
 0x42c   : > { %1486 = vst.msk [vmem:[#allocation5 + $0x20] sm:$0x3f] %vm1074_vm0, %v1481_v18  ;;  %v2622_v18 = vpack.c.bf16 %v1831_v17, %v1830_v14  ;;  %v2011_v17 = vld [vmem:[%s3480_s12 + $0x10] sm:$0xff] }
 0x42d   : > { %v1488_v19 = vld [vmem:[#allocation5 + $0x10] ss:$2 sm:$0xff]  ;;  %v1491_v20 = vld [vmem:[#allocation5 + $0x11] ss:$2 sm:$0xff] }
 0x42e   : > { %v1494_v22 = vmax.f32 %v1488_v19, %v1491_v20  ;;  %v1832_v19 = vld [vmem:[%s3475_s7 + $0x20] sm:$0xff]  ;;  %v1833_v20 = vld [vmem:[%s3475_s7 + $0x28] sm:$0xff] }
 0x42f   : > { %v2625_v21 = vpack.c.bf16 %v1833_v20, %v1832_v19  ;;  %v1937_v20 = vld [vmem:[%s3479_s11] sm:$0x1] }
 0x430   : > { %1503 = vrot.lane.b32.xlu0 %v1494_v22, %s2806_s22  ;;  %v1834_v22 = vld [vmem:[%s3475_s7 + $0x30] sm:$0xff] }
 0x433   : > { %v1489_v24 = vld [vmem:[#allocation5 + $0x20] ss:$2 sm:$0x7]  ;;  %v1492_v25 = vld [vmem:[#allocation5 + $0x21] ss:$2 sm:$0x7] }
 0x434   : > { %v1495_v26 = vmax.f32 %v1489_v24, %v1492_v25 }
 0x436   : > { %1513 = vrot.lane.b32.xlu1 %v1495_v26, %s2806_s22  ;;  %s2290_s22 = sshll.u32 %s2906_s17, 4  ;;  %s2809_s17 = smov [#allocation7]  }
 0x437   : > { %s3426_s20 = scalar_lea.hbm %s3482_s14, %s2290_s22  ;;  %s2741_s15 = sshll.u32 %s2809_s17, 4  ;;  %s2742_s15 = int_to_ptr.vmem [resolvable:$false] %s2741_s15 }
 0x49a   : > { %v1498_v27 = vpop.permute.xlu1 %1497 }
 0x49b   : > { %1501 = vst.msk [vmem:[#allocation4 + $0x1] sm:$0xf] %vm1500_vm3, %v1498_v27 }
 0x49c   : > { %1507 = vst.msk [vmem:[#allocation4 + $0x2] sm:$0xe0] %vm1506_vm4, %v1498_v27 }
 0x4a2   : > { %v1504_v28 = vpop.permute.xlu0 %1503 }
 0x4a3   : > { %1509 = vst.msk [vmem:[#allocation4 + $0xa] sm:$0x1] %vm1508_vm5, %v1504_v28  ;;  %v1531_v30 = vld [vmem:[#allocation4 + $0x1] sm:$0xff] }
 0x4a4   : > { %1511 = vst.msk [vmem:[#allocation4 + $0xb] sm:$0x3c] %vm1510_vm6, %v1504_v28  ;;  %v1687_v32 = vld [vmem:[#allocation4 + $0x2] sm:$0xff] }
 0x4a5   : > { %1517 = vst.msk [vmem:[#allocation4 + $0xc] sm:$0x80] %vm1516_vm7, %v1504_v28  ;;  %v1520_v41 = vld [vmem:[#allocation4] sm:$0xff] }
 0x4a8   : > { %v1514_v29 = vpop.permute.xlu1 %1513 }
 0x4a9   : > { %1519 = vst.msk [vmem:[#allocation4 + $0x14] sm:$0x7] %vm1518_vm8, %v1514_v29 }
 0x4ab   : > { %v1532_v31 = vld [vmem:[#allocation4 + $0x9] sm:$0xff] }
 0x4ac   : > { %v1688_v33 = vld [vmem:[#allocation4 + $0xa] sm:$0xff]  ;;  %v1534_v34 = vpack.c.bf16 %v1532_v31, %v1531_v30 }
 0x4ad   : > { %v1690_v35 = vpack.c.bf16 %v1688_v33, %v1687_v32  ;;  %v1521_v36 = vld [vmem:[#allocation4 + $0x8] sm:$0xff] }
 0x4ae   : > { %2529 = vmatprep.mubr.msk.bf16.mxu1 %vm516_vm2, %v1534_v34  ;;  %v1523_v44 = vpack.c.bf16 %v1521_v36, %v1520_v41  ;;  %v1921_v34 = vld [vmem:[%s3478_s10] sm:$0xff]  ;;  %v1923_v36 = vld [vmem:[%s3478_s10 + $0x10] sm:$0xff]  ;;  %v1924_v41 = vld [vmem:[%s3478_s10 + $0x18] sm:$0xff] }
 0x4af   : > { %2549 = vmatprep.mubr.msk.bf16.mxu0 %vm516_vm2, %v1690_v35  ;;  %v1922_v35 = vld [vmem:[%s3478_s10 + $0x8] sm:$0xff] }
 0x4b0   : > { %v1533_v37 = vld [vmem:[#allocation4 + $0x11] sm:$0x3f] }
 0x4b1   : > { %v1689_v38 = vld [vmem:[#allocation4 + $0x12] sm:$0x3f]  ;;  %v1535_v39 = vpack.c.bf16 %v1533_v37, %v1533_v37 }
 0x4b2   : > { %v1691_v40 = vpack.c.bf16 %v1689_v38, %v1689_v38  ;;  %v1522_v45 = vld [vmem:[#allocation4 + $0x10] sm:$0x3f] }
 0x4b3   : > { %2530 = vmatmul.mubr.msk.bf16.vlgmr.msra.gmra.mrb[44].mxu1 %vm516_vm2, %v1535_v39  ;;  %v1524_v46 = vpack.c.bf16 %v1522_v45, %v1522_v45  ;;  %v2631_v39 = vpack.c.bf16 %v1922_v35, %v1921_v34 }
 0x4b4   : > { %2550 = vmatmul.mubr.msk.bf16.vlgmr.msra.gmra.mrb[52].mxu0 %vm516_vm2, %v1691_v40  ;;  %2534 = vmatpush3.bf16.msra.mxu1 %v2734_v23  ;;  %v1835_v23 = vld [vmem:[%s3475_s7 + $0x38] sm:$0xff] }
 0x4b5   : > { %2539 = vmatprep.mubr.msk.bf16.mxu1 %vm516_vm2, %v1523_v44  ;;  %2535 = vmatprep.subr.bf16.mxu1 %v2735_v42  ;;  %v2628_v24 = vpack.c.bf16 %v1835_v23, %v1834_v22  ;;  %v1925_v44 = vld [vmem:[%s3478_s10 + $0x20] sm:$0xff] }
 0x4b6   : > { %2604 = vmatprep.mubr.msk.f32.mxu0 %vm2802_vm1, %v2801_v1  ;;  %2632 = vmatpush3.bf16.msra.mxu0 %v2631_v39 }
 0x4b7   : > { %2633 = vmatprep.subr.bf16.mxu0 %v2807_v15 }
 0x4b8   : > { %2536 = vmatpush3.bf16.msra.mxu1 %v2735_v42  ;;  %v2634_v42 = vpack.c.bf16 %v1924_v41, %v1923_v36 }
 0x4b9   : > { %2537 = vmatprep.subr.bf16.mxu1 %v2736_v43 }
 0x4ba   : > { %2635 = vmatpush3.bf16.msra.mxu0 %v2634_v42 }
 0x4bb   : > { %2636 = vmatprep.subr.bf16.mxu0 %v2807_v15 }
 0x4bc   : > { %2538 = vmatpush3.bf16.msra.mxu1 %v2736_v43  ;;  %v1926_v43 = vld [vmem:[%s3478_s10 + $0x28] sm:$0xff] }
 0x4bd   : > { %2618 = vmatprep.subr.bf16.mxu1 %v2807_v15  ;;  %v2637_v45 = vpack.c.bf16 %v1926_v43, %v1925_v44 }
 0x4bf   : > { %2540 = vmatmul.mubr.msk.bf16.vlgmr.msra.gmra.mrb[48].mxu1 %vm516_vm2, %v1524_v46  ;;  %v1927_v46 = vld [vmem:[%s3478_s10 + $0x30] sm:$0xff]  ;;  %2638 = vmatpush3.bf16.msra.mxu0 %v2637_v45 }
 0x4c0   : > { %2569 = vmatprep.mubr.msk.f32.mxu1 %vm2802_vm1, %v2801_v1  ;;  %2620 = vmatpush3.bf16.msra.mxu1 %v2619_v16 }
 0x4c1   : > { %2621 = vmatprep.subr.bf16.mxu1 %v2807_v15  ;;  %2639 = vmatprep.subr.bf16.mxu0 %v2807_v15 }
 0x4c4   : > { %2623 = vmatpush3.bf16.msra.mxu1 %v2622_v18  ;;  %v2012_v18 = vld [vmem:[%s3480_s12 + $0x18] sm:$0xff] }
 0x4c5   : > { %2624 = vmatprep.subr.bf16.mxu1 %v2807_v15  ;;  %v2658_v19 = vpack.c.bf16 %v2012_v18, %v2011_v17 }
 0x4c8   : > { %2626 = vmatpush3.bf16.msra.mxu1 %v2625_v21 }
 0x4c9   : > { %2627 = vmatprep.subr.bf16.mxu1 %v2807_v15 }
 0x4cc   : > { %2629 = vmatpush3.bf16.msra.mxu1 %v2628_v24 }
 0x4cd   : > { %2654 = vmatprep.subr.bf16.mxu1 %v2807_v15 }
 0x586   : > { %v2531_v47 = vpop.f32.mrb[44].mxu1 }
 0x587   : > { %v2551_v49 = vpop.f32.mrb[52].mxu0  ;;  %v1601_v50 = vpop.f32.mrb[45].mxu1 }
 0x588   : > { %v1757_v48 = vpop.f32.mrb[53].mxu0  ;;  %v2532_v51 = vpop.f32.mrb[46].mxu1 }
 0x589   : > { %v2552_v52 = vpop.f32.mrb[54].mxu0  ;;  %v1604_v54 = vpop.f32.mrb[47].mxu1 }
 0x58a   : > { %v1760_v55 = vpop.f32.mrb[55].mxu0 }
 0x592   : > { %v2541_v53 = vpop.f32.mrb[48].mxu1 }
 0x593   : > { %v1682_v56 = vadd.f32 %v2541_v53, %v2531_v47  ;;  %v1673_v57 = vpop.f32.mrb[49].mxu1  ;;  %v1928_v47 = vld [vmem:[%s3478_s10 + $0x38] sm:$0xff] }
 0x594   : > { %v1674_v58 = vadd.f32 %v1673_v57, %v1601_v50  ;;  %v2542_v59 = vpop.f32.mrb[50].mxu1  ;;  %v2640_v50 = vpack.c.bf16 %v1928_v47, %v1927_v46 }
 0x595   : > { %v1773_v60 = vadd.f32 %v2551_v49, %v1682_v56  ;;  %v1676_v62 = vpop.f32.mrb[51].mxu1  ;;  %v1931_v56 = vld [vmem:[%s3478_s10 + $0x50] sm:$0xff]  ;;  %v1934_v59 = vld [vmem:[%s3478_s10 + $0x68] sm:$0xff] }
 0x596   : > { %v1771_v63 = vadd.f32 %v1757_v48, %v1674_v58  ;;  %v1677_v0 = vadd.f32 %v1676_v62, %v1604_v54  ;;  %2641 = vmatpush3.bf16.msra.mxu0 %v2640_v50  ;;  %v1929_v54 = vld [vmem:[%s3478_s10 + $0x40] sm:$0xff]  ;;  %v1936_v62 = vld [vmem:[%s3478_s10 + $0x78] sm:$0xff] }
 0x597   : > { %v1783_v2 = vadd.f32 %v2287_v61, %v1773_v60  ;;  %2642 = vmatprep.subr.bf16.mxu0 %v2807_v15  ;;  %v1933_v58 = vld [vmem:[%s3478_s10 + $0x60] sm:$0xff] }
 0x598   : > { %v1781_v3 = vadd.f32 %v2287_v61, %v1771_v63  ;;  %v1772_v4 = vadd.f32 %v1760_v55, %v1677_v0  ;;  %v1930_v55 = vld [vmem:[%s3478_s10 + $0x48] sm:$0xff]  ;;  %v2649_v60 = vpack.c.bf16 %v1934_v59, %v1933_v58  ;;  %v2009_v0 = vld [vmem:[%s3480_s12] sm:$0xff] }
 0x599   : > { %v1789_v9 = vmul.f32 0.01, %v1783_v2  ;;  %vm1786_vm11 = vcmp.gt.f32.partialorder %v1783_v2, 0.0  ;;  %v2643_v53 = vpack.c.bf16 %v1930_v55, %v1929_v54 }
 0x59a   : > { %v1782_v5 = vadd.f32 %v2287_v61, %v1772_v4  ;;  %vm1784_vm9 = vcmp.gt.f32.partialorder %v1781_v3, 0.0  ;;  %v1787_v6 = vmul.f32 0.01, %v1781_v3  ;;  %v1935_v61 = vld [vmem:[%s3478_s10 + $0x70] sm:$0xff] }
 0x59b   : > { %v1792_v11 = vsel %vm1786_vm11, %v1783_v2, %v1789_v9  ;;  %2644 = vmatpush3.bf16.msra.mxu0 %v2643_v53  ;;  %v2652_v63 = vpack.c.bf16 %v1936_v62, %v1935_v61  ;;  %v2010_v2 = vld [vmem:[%s3480_s12 + $0x8] sm:$0xff] }
 0x59c   : > { %v1790_v7 = vsel %vm1784_vm9, %v1781_v3, %v1787_v6  ;;  %vm1785_vm10 = vcmp.gt.f32.partialorder %v1782_v5, 0.0  ;;  %v1788_v8 = vmul.f32 0.01, %v1782_v5  ;;  %2645 = vmatprep.subr.bf16.mxu0 %v2807_v15  ;;  %v2655_v3 = vpack.c.bf16 %v2010_v2, %v2009_v0 }
 0x59d   : > { %1796 = vrot.lane.b32.xlu0 %v1790_v7, %s2804_s25 }
 0x59e   : > { %v1791_v10 = vsel %vm1785_vm10, %v1782_v5, %v1788_v8 }
 0x59f   : > { %1798 = vrot.lane.b32.xlu1 %v1791_v10, %s2804_s25 }
 0x5a1   : > { %1800 = vrot.lane.b32.xlu0 %v1792_v11, %s2804_s25  ;;  %s2187_s25 = sshll.u32 %s2940_s27, 2 }
 0x5a2   : > { %s494_s18 = scalar_lea.vmem %s3476_s8, %s2187_s25  ;;  %s498_s2 = scalar_lea.vmem %s3477_s9, %s2187_s25 }
 0x5a3   : > { %v1910_v4 = vld [vmem:[%s494_s18] sm:$0xf]  ;;  %s485_s18 = scalar_lea.vmem [#allocation7], %s484_s26  ;;  %s2743_s25 = scalar_lea.vmem %s2742_s15, 32 }
 0x5a4   : > { %v1912_v6 = vld [vmem:[%s498_s2] sm:$0xf]  ;;  %s2102_s0 = sshll.u32 %s485_s18, 4  ;;  %s2090_s2 = scalar_lea.sflag [#allocation8], %s484_s26  ;;  %s3428_s0 = int_to_ptr.vmem [resolvable:$true] %s2102_s0 }
 0x5a5   : > { %p2744_p0 = scmp.lt.s32.totalorder %s3428_s0, %s2742_s15 }
 0x60f   : > { %v1797_v25 = vpop.permute.xlu0 %1796 }
 0x610   : > { %v1805_v26 = vmax.f32 %v1790_v7, %v1797_v25  ;;  %v2013_v25 = vld [vmem:[%s3481_s13] sm:$0x1] }
 0x611   : > { %v1799_v27 = vpop.permute.xlu1 %1798 }
 0x612   : > { %1808 = vst.msk [vmem:[#allocation5] sm:$0xff] %vm1065_vm14, %v1805_v26  ;;  %v1806_v28 = vmax.f32 %v1791_v10, %v1799_v27 }
 0x613   : > { %v1801_v29 = vpop.permute.xlu0 %1800 }
 0x614   : > { %1809 = vst.msk [vmem:[#allocation5 + $0x8] sm:$0xff] %vm1065_vm14, %v1806_v28  ;;  %v1807_v30 = vmax.f32 %v1792_v11, %v1801_v29 }
 0x616   : > { %1810 = vst.msk [vmem:[#allocation5 + $0x10] sm:$0x3f] %vm1074_vm0, %v1807_v30  ;;  %vm1836_vm0 = vcmask 523264  }
 0x61b   : > { %v1811_v31 = vld [vmem:[#allocation5] ss:$2 sm:$0xff]  ;;  %v1813_v32 = vld [vmem:[#allocation5 + $0x1] ss:$2 sm:$0xff] }
 0x61c   : > { %v1815_v33 = vmax.f32 %v1811_v31, %v1813_v32 }
 0x61d   : > { %v1812_v37 = vld [vmem:[#allocation5 + $0x10] ss:$2 sm:$0x7]  ;;  %v1814_v38 = vld [vmem:[#allocation5 + $0x11] ss:$2 sm:$0x7] }
 0x61e   : > { %v1816_v40 = vmax.f32 %v1812_v37, %v1814_v38  ;;  %1817 = vst.msk [vmem:[#allocation6] sm:$0xff] %vm1065_vm14, %v1815_v33 }
 0x620   : > { %1819 = vst.msk [vmem:[#allocation6 + $0x8] sm:$0x7] %vm1818_vm12, %v1816_v40 }
 0x627   : > { %v1822_v49 = vld [vmem:[#allocation6 + $0x1] ss:$3 sm:$0xf]  ;;  %v1820_v51 = vld [vmem:[#allocation6] ss:$3 sm:$0xf] }
 0x628   : > { %1824 = vrot.lane.b32.xlu1 %v1822_v49, %s2808_s21  ;;  %s2737_s21 = scalar_lea.vmem %s3428_s0, 16 }
 0x629   : > { %p2738_p11 = scmp.ne.s32.totalorder %s3428_s0, %s2737_s21  ;;  %p2745_p1 = scmp.lt.s32.totalorder %s2743_s25, %s2737_s21 }
 0x62b   : > { %p2739_p12 = pnand %p2738_p11, %p2923_p5  ;;  %p2746_p2 = por %p2745_p1, %p2744_p0 }
 0x62d   : > { %p2740_p13 = pneg %p2739_p12 }
 0x62f   : > { %p2747_p3 = pnand %p2746_p2, %p2740_p13 }
 0x69a   : > { %v1825_v48 = vpop.permute.xlu1 %1824 }
 0x69b   : > { %v1827_v52 = vsel %vm1065_vm14, %v1820_v51, %v1825_v48 }
 0x69c   : > { %2570 = vmatmul.mubr.msk.f32.vlgmr.msra.gmra.mrb[52].mxu1 %vm1836_vm0, %v1827_v52 }
 0x69d   : > { %2615 = vmatprep.mubr.msk.f32.mxu1 %vm2802_vm1, %v2801_v1  ;;  %v1932_v1 = vld [vmem:[%s3478_s10 + $0x58] sm:$0xff]  ;;  %2656 = vmatpush3.bf16.msra.mxu1 %v2655_v3  ;;  %vm2087_vm1 = vcmask 8192  }
 0x69e   : > { %v2646_v57 = vpack.c.bf16 %v1932_v1, %v1931_v56  ;;  %2657 = vmatprep.subr.bf16.mxu1 %v2807_v15 }
 0x6a0   : > { %2647 = vmatpush3.bf16.msra.mxu0 %v2646_v57 }
 0x6a1   : > { %2648 = vmatprep.subr.bf16.mxu0 %v2807_v15  ;;  %2659 = vmatpush3.bf16.msra.mxu1 %v2658_v19 }
 0x6a4   : > { %2650 = vmatpush3.bf16.msra.mxu0 %v2649_v60 }
 0x6a5   : > { %2651 = vmatprep.subr.bf16.mxu0 %v2807_v15 }
 0x6a8   : > { %2653 = vmatpush3.bf16.msra.mxu0 %v2652_v63 }
 0x76f   : > { %v1906_v5 = vpop.f32.mrb[52].mxu1 }
 0x770   : > { %v1911_v7 = vmul.f32 %v1910_v4, %v1906_v5  ;;  %v2571_v8 = vpop.f32.mrb[53].mxu1 }
 0x772   : > { %v1913_v9 = vadd.f32 %v1912_v6, %v1911_v7 }
 0x774   : > { %v1914_v10 = vsel %vm1185_vm15, %v1913_v9, inf }
 0x775   : > { %v1915_v11 = vrot.slane %v1914_v10, 4 }
 0x777   : > { %v1916_v12 = vmin.f32 %v1914_v10, %v1915_v11 }
 0x779   : > { %v1917_v13 = vrot.slane %v1916_v12, 2 }
 0x77b   : > { %v1918_v14 = vmin.f32 %v1916_v12, %v1917_v13 }
 0x77d   : > { %v1919_v15 = vrot.slane %v1918_v14, 1 }
 0x77f   : > { %v1920_v16 = vmin.f32 %v1918_v14, %v1919_v15 }
 0x781   : > { %2605 = vmatmul.mubr.f32.vlgmr.msra.gmra.mrb[56].mxu0 %v1920_v16 }
 0x854   : > { %v2004_v21 = vpop.f32.mrb[56].mxu0 }
 0x855   : > { %v2005_v22 = vadd.f32 %v2004_v21, %v1937_v20  ;;  %v2606_v23 = vpop.f32.mrb[57].mxu0 }
 0x857   : > { %v2008_v24 = vmax.f32 %v2005_v22, 0.0 }
 0x859   : > { %2616 = vmatmul.mubr.msk.f32.vlgmr.msra.gmra.mrb[54].mxu1 %vm1065_vm14, %v2008_v24 }
 0x92c   : > { %v2083_v26 = vpop.f32.mrb[54].mxu1 }
 0x92d   : > { %v2084_v27 = vadd.f32 %v2083_v26, %v2013_v25  ;;  %v2617_v28 = vpop.f32.mrb[55].mxu1 }
 0x92f   : > { %2088 = vst.msk [vmem:[%s485_s18] sm:$0x1] %vm2087_vm1, %v2084_v27 }
 0x930   : > { %2750 = shalt.err (!%p2747_p3)
}
 0x931   : > { %s2751_s26 = scalar_lea.hbm %s3426_s20, 16  ;;  %s2755_s18 = scalar_lea.hbm %s3482_s14, 32 }
 0x932   : > { %p2752_p4 = scmp.ne.s32.totalorder %s3426_s20, %s2751_s26  ;;  %p2756_p9 = scmp.lt.u32.totalorder %s3426_s20, %s3482_s14 }
 0x933   : > { %p2757_p10 = scmp.lt.u32.totalorder %s2755_s18, %s2751_s26  ;;  %p2759_p12 = scmp.lt.u32.totalorder %s2751_s26, %s3426_s20 }
 0x934   : > { %p2753_p7 = pnand %p2752_p4, %p2923_p5 }
 0x935   : > { %p2758_p11 = por %p2757_p10, %p2756_p9 }
 0x936   : > { %p2754_p8 = pneg %p2753_p7 }
 0x937   : > { %p2760_p13 = por %p2759_p12, %p2758_p11 }
 0x939   : > { %p2761_p0 = pnand %p2760_p13, %p2754_p8 }
 0x93b   : > { %2764 = shalt.err (!%p2761_p0)
}
 0x93c   : > { %2660 = dma.vmem_to_hbm [thread:$0]  (%p2923_p5), %s3428_s0, 16, %s3426_s20, %s2090_s2  }
 0x93d PF: > { %p2666_p1 = scmp.ge.s32.totalorder %s2799_s16, 2  ;;  %s2114_s21 = sand.u32 1, %s2787_s29  }
 0x93e   : > { %s2115_s17 = scalar_lea.sflag [#allocation8], %s2114_s21 }
 0x93f   : > { %p2663_p2 = pnand %p2666_p1, %p2927_p6 }
 0x941   : > { %2782 = dma.done.wait (!%p2663_p2), %s2115_s17, 16  }
 0x942   : > { %2784 = vsyncadd (!%p2663_p2), %s2115_s17, 4294967280  ;;  %s3494_s15 = sld [smem:[#allocation10_spill]]  ;;  %s3495_s25 = sld [smem:[#allocation11_spill]] }
 0x943   : > { %p24_p3 = scmp.ge.s32.totalorder %s2910_s19, 4   ;;  %s3496_s29 = smov %s2791_s30 }
 0x944   : > { %s3499_s16 = smov %s2910_s19 }
 0x945   :  { %26 = sbr.rel (!%p24_p3) target bundleno = 7 (0x7), region = 133 }
 0x948   : > { %s3497_s30 = smov %s3494_s15  ;;  %s3498_s15 = smov %s3495_s25 }
 0x94c   :  { %2119 = vsyncpa [#allocation8], 1 }
 0x94d   :  { %2121 = vsyncpa [#allocation8 + $0x1], 1 }

</bundles_post_ra>
